<compile_context>
chip_gen: v6e
topology: v6e:2x2x1
jax: 0.10.0
libtpu: 0.0.40
codegen_flags: <defaults>
</compile_context>

<pallas_src>
import jax
import jax.numpy as jnp
from jax import lax
from jax.experimental import pallas as pl
from jax.experimental.pallas import tpu as pltpu

F32 = jnp.float32
BF16 = jnp.bfloat16
LANES = 128        # every weight block / activation / output row is 128-lane dense
N_LAYERS = 19      # total linear layers in the fused network


def _rup8(v):
    return -(-v // 8) * 8


def _relu(x):
    return jnp.maximum(x, 0.0)


def _softplus(x):
    # numerically stable softplus, f32
    return jnp.maximum(x, 0.0) + jnp.log(1.0 + jnp.exp(-jnp.abs(x)))


# ----------------------------------- kernel ----------------------------------

def _make_kernel(*, Pc, Pd, Pt, y_dim, inv_nc, inv_n, inv_ndc):
    """One grid step == one batch tile (TB batch elements flattened into rows)."""

    def kernel(xall_ref, yall_ref, pc_ref, pd1_ref, pd2_ref, bt_ref,
               w_ref, b_ref, out_ref):

        def W(i):
            # static, tile-aligned slice of the packed bf16 weight slab
            return w_ref[i * LANES:(i + 1) * LANES, :]

        def lin(a, i):
            # bf16 matmul inputs, f32 MXU accumulation, f32 bias epilogue
            return (jnp.dot(a.astype(BF16), W(i), preferred_element_type=jnp.float32)
                    + b_ref[i:i + 1, :])

        def pool(sel_ref, a, scale):
            # 0/1 bf16 selector matmul (exact), 1/n scale applied in the f32 epilogue
            return jnp.dot(sel_ref[...], a.astype(BF16),
                           preferred_element_type=jnp.float32) * scale

        # ---- fused x_encoder over [context | D | target] rows (one matmul chain)
        xe = lin(_relu(lin(xall_ref[0], 0)), 1)          # [Pc+Pd+Pt, 128]
        xe_c = xe[:Pc]
        xe_d = xe[Pc:Pc + Pd]
        xe_t = xe[Pc + Pd:]

        y_all = yall_ref[0]                              # [Pc+Pd, 128] (lane-padded Y values)

        # ---- encode_globally (CNP): sum-merge XY encoder, per-batch mean pool, output affine
        h = _relu(lin(xe_c, 2) + y_all[:Pc])
        h = _relu(lin(h, 3))
        h = _relu(lin(h, 4))
        R = lin(pool(pc_ref, h, inv_nc), 5)              # [TB, 128], valid lanes [0:r_dim]

        # ---- encode_D_cntxt: ic XY encoder, per-dataset mean, ic R encoder, mean over datasets
        h = _relu(lin(xe_d, 6) + y_all[Pc:])
        h = _relu(lin(h, 7))
        h = _relu(lin(h, 8))
        m = lin(pool(pd1_ref, h, inv_n), 9)              # [TB*n_dc, 128] per-dataset reps
        h = _relu(lin(m, 10))
        h = _relu(lin(h, 11))
        R2 = lin(pool(pd2_ref, h, inv_ndc), 12)          # [TB, 128], valid lanes [r_dim:tot_r_dim]

        # ---- decode: [R|R2] laid out in disjoint lanes -> concat-free; broadcast to target rows
        r_rows = R + R2                                  # [TB, 128] == cat(R, R2) in lanes
        r_b = jnp.dot(bt_ref[...], r_rows.astype(BF16),
                      preferred_element_type=jnp.float32)   # [Pt, 128] per-target representation
        h = _relu(lin(xe_t, 13) + r_b)                   # decoder sum-merge
        h = _relu(lin(h, 14))
        h = _relu(lin(h, 15))
        h = _relu(lin(h, 16))
        h = _relu(lin(h, 17))
        raw = lin(h, 18)                                 # [Pt, 128]; loc|scale in lanes [0:2*y_dim], rest exactly 0

        # dense 128-lane store of the raw head (loc transform = identity), then overwrite only the
        # scale lanes with 0.01 + 0.99*softplus computed on the narrow slice.
        out_ref[0] = raw
        s = raw[:, y_dim:2 * y_dim]
        out_ref[0, :, y_dim:2 * y_dim] = 0.01 + 0.99 * _softplus(s)

    return kernel


# ------------------------------ parameter creation ------------------------------

def init_params(key, x_dim, y_dim, r_dim, ic_r_dim):
    """Pack all layers into one bf16 [19*128, 128] weight slab + one f32 [19, 128] bias slab."""
    x_transf_dim = r_dim                     # x_transf_dim = -1  -> r_dim
    tot_r_dim = r_dim + ic_r_dim
    assert x_dim <= LANES and y_dim <= LANES
    assert tot_r_dim <= LANES and 2 * y_dim <= LANES

    # (real_din, real_dout, output lane offset)
    layout = [
        (x_dim,        r_dim,        0),      # 0  x_encoder hidden
        (r_dim,        x_transf_dim, 0),      # 1  x_encoder out
        (x_transf_dim, y_dim,        0),      # 2  global XY sum-merge resizer
        (y_dim,        r_dim,        0),      # 3  global XY hidden 1
        (r_dim,        r_dim,        0),      # 4  global XY hidden 2
        (r_dim,        r_dim,        0),      # 5  global XY out (pooled before) -> R in lanes [0:r_dim]
        (x_transf_dim, y_dim,        0),      # 6  ic XY sum-merge resizer
        (y_dim,        ic_r_dim,     0),      # 7  ic XY hidden 1
        (ic_r_dim,     ic_r_dim,     0),      # 8  ic XY hidden 2
        (ic_r_dim,     ic_r_dim,     0),      # 9  ic XY out (pooled before)
        (ic_r_dim,     ic_r_dim,     0),      # 10 ic R hidden 1
        (ic_r_dim,     ic_r_dim,     0),      # 11 ic R hidden 2
        (ic_r_dim,     ic_r_dim,     r_dim),  # 12 ic R out -> R2 in lanes [r_dim:tot_r_dim]
        (x_transf_dim, tot_r_dim,    0),      # 13 decoder sum-merge resizer
        (tot_r_dim,    tot_r_dim,    0),      # 14 decoder hidden 1
        (tot_r_dim,    tot_r_dim,    0),      # 15 decoder hidden 2
        (tot_r_dim,    tot_r_dim,    0),      # 16 decoder hidden 3
        (tot_r_dim,    tot_r_dim,    0),      # 17 decoder hidden 4
        (tot_r_dim,    2 * y_dim,    0),      # 18 fused loc|scale head
    ]
    assert len(layout) == N_LAYERS

    keys = jax.random.split(key, N_LAYERS)
    wblocks, brows = [], []
    for k, (din, dout, ocol) in zip(keys, layout):
        kw, kb = jax.random.split(k)
        s = jnp.sqrt(2.0 / (din + dout)).astype(F32)
        w = s * jax.random.normal(kw, (din, dout), dtype=F32)
        b = 0.01 * jax.random.normal(kb, (dout,), dtype=F32)
        wb = jnp.zeros((LANES, LANES), F32).at[:din, ocol:ocol + dout].set(w)
        bb = jnp.zeros((LANES,), F32).at[ocol:ocol + dout].set(b)
        wblocks.append(wb)
        brows.append(bb)
    wslab = jnp.concatenate(wblocks, axis=0).astype(BF16)   # [19*128, 128] bf16
    bslab = jnp.stack(brows, axis=0)                         # [19, 128]    f32
    return wslab, bslab


# ----------------------------------- forward -----------------------------------

def ic_np_forward(params, X_cntxt, Y_cntxt, X_trgt, D_cntxt, *, y_dim, batch_tile=None):
    wslab, bslab = params
    B, Nc, x_dim = X_cntxt.shape
    Nt = X_trgt.shape[1]
    Dx, Dy = D_cntxt
    _, n_dc, n, _ = Dx.shape

    if batch_tile is None:
        # tiny B: one grid step (no per-step overhead, max sublane fill on v5e/v6e);
        # larger even B: 2 "parallel" tiles so both v7x TensorCores are used.
        batch_tile = B if (B < 4 or B % 2 != 0) else B // 2
    assert B % batch_tile == 0
    TB = batch_tile
    num_tiles = B // TB

    Pc = _rup8(TB * Nc)
    Pd = _rup8(TB * n_dc * n)
    Pt = _rup8(TB * Nt)

    def pack_rows(a, rows_valid, rows_pad):
        # [num_tiles, rows_valid, d] -> [num_tiles, rows_pad, LANES] (zero pad rows + lanes)
        d = a.shape[-1]
        return jnp.pad(a, ((0, 0), (0, rows_pad - rows_valid), (0, LANES - d)))

    # fused x slab: [context | D | target] rows, each segment 8-row aligned, bf16 (matmul input)
    x_all = jnp.concatenate([
        pack_rows(X_cntxt.reshape(num_tiles, TB * Nc, x_dim), TB * Nc, Pc),
        pack_rows(Dx.reshape(num_tiles, TB * n_dc * n, x_dim), TB * n_dc * n, Pd),
        pack_rows(X_trgt.reshape(num_tiles, TB * Nt, x_dim), TB * Nt, Pt),
    ], axis=1).astype(BF16)

    # y slab: [context | D] rows, f32 (added in the f32 sum-merge epilogue)
    y_all = jnp.concatenate([
        pack_rows(Y_cntxt.reshape(num_tiles, TB * Nc, y_dim), TB * Nc, Pc),
        pack_rows(Dy.reshape(num_tiles, TB * n_dc * n, y_dim), TB * n_dc * n, Pd),
    ], axis=1).astype(F32)

    # 0/1 selector matrices (exact in bf16); 1/Nc, 1/n, 1/n_dc applied in-kernel in f32
    eye_tb = jnp.eye(TB, dtype=F32)
    pool_c = jnp.pad(jnp.repeat(eye_tb, Nc, axis=1),
                     ((0, 0), (0, Pc - TB * Nc))).astype(BF16)               # [TB, Pc]
    pool_d1 = jnp.pad(jnp.repeat(jnp.eye(TB * n_dc, dtype=F32), n, axis=1),
                      ((0, 0), (0, Pd - TB * n_dc * n))).astype(BF16)        # [TB*n_dc, Pd]
    pool_d2 = jnp.repeat(eye_tb, n_dc, axis=1).astype(BF16)                  # [TB, TB*n_dc]
    bcast_t = jnp.pad(jnp.repeat(eye_tb, Nt, axis=0),
                      ((0, Pt - TB * Nt), (0, 0))).astype(BF16)              # [Pt, TB]

    kernel = _make_kernel(Pc=Pc, Pd=Pd, Pt=Pt, y_dim=y_dim,
                          inv_nc=1.0 / Nc, inv_n=1.0 / n, inv_ndc=1.0 / n_dc)

    out = pl.pallas_call(
        kernel,
        out_shape=jax.ShapeDtypeStruct((num_tiles, Pt, LANES), F32),
        grid=(num_tiles,),
        in_specs=[
            pl.BlockSpec((1, Pc + Pd + Pt, LANES), lambda t: (t, 0, 0)),
            pl.BlockSpec((1, Pc + Pd, LANES), lambda t: (t, 0, 0)),
            pl.BlockSpec(pool_c.shape, lambda t: (0, 0)),
            pl.BlockSpec(pool_d1.shape, lambda t: (0, 0)),
            pl.BlockSpec(pool_d2.shape, lambda t: (0, 0)),
            pl.BlockSpec(bcast_t.shape, lambda t: (0, 0)),
            pl.BlockSpec(wslab.shape, lambda t: (0, 0)),
            pl.BlockSpec(bslab.shape, lambda t: (0, 0)),
        ],
        out_specs=pl.BlockSpec((1, Pt, LANES), lambda t: (t, 0, 0)),
        compiler_params=pltpu.CompilerParams(
            dimension_semantics=("parallel",),           # megacore sharding over batch tiles
            vmem_limit_bytes=32 * 1024 * 1024),          # safe on v5e/v6e and v7x's 64 MiB VMEM
    )(x_all, y_all, pool_c, pool_d1, pool_d2, bcast_t, wslab, bslab)

    out = out[:, :TB * Nt, :].reshape(B, Nt, LANES)
    loc = out[:, :, :y_dim][None]                        # [1, B, Nt, y_dim]
    scale = out[:, :, y_dim:2 * y_dim][None]             # already 0.01 + 0.99*softplus in-kernel
    # deterministic path: no latents (p_yCc represented by MultivariateNormalDiag suff-stats)
    z_samples, q_zCc, q_zCct = None, None, None
    return (loc, scale), z_samples, q_zCc, q_zCct


# ------------------------------------- main -------------------------------------

if __name__ == "__main__":
    x_dim, y_dim, r_dim, ic_r_dim = 2, 1, 32, 32
    B, Nc, Nt, n_dc, n = 2, 8, 16, 3, 8

    key = jax.random.PRNGKey(0)
    kp, kx1, ky1, kx2, kdx, kdy = jax.random.split(key, 6)
    params = init_params(kp, x_dim, y_dim, r_dim, ic_r_dim)

    X_cntxt = jax.random.uniform(kx1, (B, Nc, x_dim), minval=-1.0, maxval=1.0, dtype=F32)
    Y_cntxt = jax.random.normal(ky1, (B, Nc, y_dim), dtype=F32)
    X_trgt = jax.random.uniform(kx2, (B, Nt, x_dim), minval=-1.0, maxval=1.0, dtype=F32)
    D_X = jax.random.uniform(kdx, (B, n_dc, n, x_dim), minval=-1.0, maxval=1.0, dtype=F32)
    D_Y = jax.random.normal(kdy, (B, n_dc, n, y_dim), dtype=F32)

    (loc, scale), z_samples, q_zCc, q_zCct = ic_np_forward(
        params, X_cntxt, Y_cntxt, X_trgt, (D_X, D_Y), y_dim=y_dim)

    jax.block_until_ready((loc, scale))
    assert loc.shape == (1, B, Nt, y_dim), loc.shape
    assert scale.shape == (1, B, Nt, y_dim), scale.shape
    assert bool(jnp.all(scale > 0.0))
    assert bool(jnp.all(jnp.isfinite(loc))) and bool(jnp.all(jnp.isfinite(scale)))
    print("KERNEL_OK")
</pallas_src>

<mosaic_0001>
module attributes {stable_mosaic.version = 11 : i64} {
  func.func @kernel(%arg0: i32, %arg1: memref<1x96x128xbf16, #tpu.memory_space<vmem>>, %arg2: memref<1x64x128xf32, #tpu.memory_space<vmem>>, %arg3: memref<2x16xbf16, #tpu.memory_space<vmem>>, %arg4: memref<6x48xbf16, #tpu.memory_space<vmem>>, %arg5: memref<2x6xbf16, #tpu.memory_space<vmem>>, %arg6: memref<32x2xbf16, #tpu.memory_space<vmem>>, %arg7: memref<2432x128xbf16, #tpu.memory_space<vmem>>, %arg8: memref<19x128xf32, #tpu.memory_space<vmem>>, %arg9: memref<1x32x128xf32, #tpu.memory_space<vmem>>) attributes {dimension_semantics = [#tpu.dimension_semantics<parallel>], iteration_bounds = array<i64: 1>, scalar_prefetch = 0 : i64, scratch_operands = 0 : i64, tpu.core_type = #tpu.core_type<tc>, window_params = [{transform_indices = @transform_0, window_bounds = array<i64: 1, 96, 128>}, {transform_indices = @transform_1, window_bounds = array<i64: 1, 64, 128>}, {pipeline_mode = #tpu.pipeline_mode<synchronous>, transform_indices = @transform_2, window_bounds = array<i64: 2, 16>}, {pipeline_mode = #tpu.pipeline_mode<synchronous>, transform_indices = @transform_3, window_bounds = array<i64: 6, 48>}, {pipeline_mode = #tpu.pipeline_mode<synchronous>, transform_indices = @transform_4, window_bounds = array<i64: 2, 6>}, {pipeline_mode = #tpu.pipeline_mode<synchronous>, transform_indices = @transform_5, window_bounds = array<i64: 32, 2>}, {pipeline_mode = #tpu.pipeline_mode<synchronous>, transform_indices = @transform_6, window_bounds = array<i64: 2432, 128>}, {pipeline_mode = #tpu.pipeline_mode<synchronous>, transform_indices = @transform_7, window_bounds = array<i64: 19, 128>}, {transform_indices = @transform_8, window_bounds = array<i64: 1, 32, 128>}]} {
    %c0 = arith.constant 0 : index
    %c0_0 = arith.constant 0 : index
    %c0_1 = arith.constant 0 : index
    %0 = vector.load %arg1[%c0, %c0_0, %c0_1] : memref<1x96x128xbf16, #tpu.memory_space<vmem>>, vector<1x96x128xbf16>
    %1 = vector.shape_cast %0 : vector<1x96x128xbf16> to vector<96x128xbf16>
    %c0_2 = arith.constant 0 : index
    %c0_3 = arith.constant 0 : index
    %2 = vector.load %arg7[%c0_2, %c0_3] : memref<2432x128xbf16, #tpu.memory_space<vmem>>, vector<128x128xbf16>
    %cst = arith.constant dense<0.000000e+00> : vector<96x128xf32>
    %3 = tpu.matmul %1, %2, %cst {dimension_numbers = #tpu.dot_dimension_numbers<[1], [0], [0], [1], [0, 0, 1, 1], [], []>} : vector<96x128xbf16>, vector<128x128xbf16>, vector<96x128xf32> -> vector<96x128xf32>
    %c0_4 = arith.constant 0 : index
    %c0_5 = arith.constant 0 : index
    %4 = vector.load %arg8[%c0_4, %c0_5] : memref<19x128xf32, #tpu.memory_space<vmem>>, vector<1x128xf32>
    %5 = vector.broadcast %4 : vector<1x128xf32> to vector<96x128xf32>
    %6 = arith.addf %3, %5 : vector<96x128xf32>
    %cst_6 = arith.constant 0.000000e+00 : f32
    %7 = vector.broadcast %cst_6 : f32 to vector<96x128xf32>
    %8 = arith.maximumf %6, %7 : vector<96x128xf32>
    %9 = arith.truncf %8 : vector<96x128xf32> to vector<96x128xbf16>
    %c128 = arith.constant 128 : index
    %c0_7 = arith.constant 0 : index
    %10 = vector.load %arg7[%c128, %c0_7] : memref<2432x128xbf16, #tpu.memory_space<vmem>>, vector<128x128xbf16>
    %cst_8 = arith.constant dense<0.000000e+00> : vector<96x128xf32>
    %11 = tpu.matmul %9, %10, %cst_8 {dimension_numbers = #tpu.dot_dimension_numbers<[1], [0], [0], [1], [0, 0, 1, 1], [], []>} : vector<96x128xbf16>, vector<128x128xbf16>, vector<96x128xf32> -> vector<96x128xf32>
    %c1 = arith.constant 1 : index
    %c0_9 = arith.constant 0 : index
    %12 = vector.load %arg8[%c1, %c0_9] : memref<19x128xf32, #tpu.memory_space<vmem>>, vector<1x128xf32>
    %13 = vector.broadcast %12 : vector<1x128xf32> to vector<96x128xf32>
    %14 = arith.addf %11, %13 : vector<96x128xf32>
    %15 = vector.extract_strided_slice %14 {offsets = [0, 0], sizes = [16, 128], strides = [1, 1]} : vector<96x128xf32> to vector<16x128xf32>
    %16 = vector.extract_strided_slice %14 {offsets = [16, 0], sizes = [48, 128], strides = [1, 1]} : vector<96x128xf32> to vector<48x128xf32>
    %17 = vector.extract_strided_slice %14 {offsets = [64, 0], sizes = [32, 128], strides = [1, 1]} : vector<96x128xf32> to vector<32x128xf32>
    %c0_10 = arith.constant 0 : index
    %c0_11 = arith.constant 0 : index
    %c0_12 = arith.constant 0 : index
    %18 = vector.load %arg2[%c0_10, %c0_11, %c0_12] : memref<1x64x128xf32, #tpu.memory_space<vmem>>, vector<1x64x128xf32>
    %19 = vector.shape_cast %18 : vector<1x64x128xf32> to vector<64x128xf32>
    %20 = arith.truncf %15 : vector<16x128xf32> to vector<16x128xbf16>
    %c256 = arith.constant 256 : index
    %c0_13 = arith.constant 0 : index
    %21 = vector.load %arg7[%c256, %c0_13] : memref<2432x128xbf16, #tpu.memory_space<vmem>>, vector<128x128xbf16>
    %cst_14 = arith.constant dense<0.000000e+00> : vector<16x128xf32>
    %22 = tpu.matmul %20, %21, %cst_14 {dimension_numbers = #tpu.dot_dimension_numbers<[1], [0], [0], [1], [0, 0, 1, 1], [], []>} : vector<16x128xbf16>, vector<128x128xbf16>, vector<16x128xf32> -> vector<16x128xf32>
    %c2 = arith.constant 2 : index
    %c0_15 = arith.constant 0 : index
    %23 = vector.load %arg8[%c2, %c0_15] : memref<19x128xf32, #tpu.memory_space<vmem>>, vector<1x128xf32>
    %24 = vector.broadcast %23 : vector<1x128xf32> to vector<16x128xf32>
    %25 = arith.addf %22, %24 : vector<16x128xf32>
    %26 = vector.extract_strided_slice %19 {offsets = [0, 0], sizes = [16, 128], strides = [1, 1]} : vector<64x128xf32> to vector<16x128xf32>
    %27 = arith.addf %25, %26 : vector<16x128xf32>
    %cst_16 = arith.constant 0.000000e+00 : f32
    %28 = vector.broadcast %cst_16 : f32 to vector<16x128xf32>
    %29 = arith.maximumf %27, %28 : vector<16x128xf32>
    %30 = arith.truncf %29 : vector<16x128xf32> to vector<16x128xbf16>
    %c384 = arith.constant 384 : index
    %c0_17 = arith.constant 0 : index
    %31 = vector.load %arg7[%c384, %c0_17] : memref<2432x128xbf16, #tpu.memory_space<vmem>>, vector<128x128xbf16>
    %cst_18 = arith.constant dense<0.000000e+00> : vector<16x128xf32>
    %32 = tpu.matmul %30, %31, %cst_18 {dimension_numbers = #tpu.dot_dimension_numbers<[1], [0], [0], [1], [0, 0, 1, 1], [], []>} : vector<16x128xbf16>, vector<128x128xbf16>, vector<16x128xf32> -> vector<16x128xf32>
    %c3 = arith.constant 3 : index
    %c0_19 = arith.constant 0 : index
    %33 = vector.load %arg8[%c3, %c0_19] : memref<19x128xf32, #tpu.memory_space<vmem>>, vector<1x128xf32>
    %34 = vector.broadcast %33 : vector<1x128xf32> to vector<16x128xf32>
    %35 = arith.addf %32, %34 : vector<16x128xf32>
    %cst_20 = arith.constant 0.000000e+00 : f32
    %36 = vector.broadcast %cst_20 : f32 to vector<16x128xf32>
    %37 = arith.maximumf %35, %36 : vector<16x128xf32>
    %38 = arith.truncf %37 : vector<16x128xf32> to vector<16x128xbf16>
    %c512 = arith.constant 512 : index
    %c0_21 = arith.constant 0 : index
    %39 = vector.load %arg7[%c512, %c0_21] : memref<2432x128xbf16, #tpu.memory_space<vmem>>, vector<128x128xbf16>
    %cst_22 = arith.constant dense<0.000000e+00> : vector<16x128xf32>
    %40 = tpu.matmul %38, %39, %cst_22 {dimension_numbers = #tpu.dot_dimension_numbers<[1], [0], [0], [1], [0, 0, 1, 1], [], []>} : vector<16x128xbf16>, vector<128x128xbf16>, vector<16x128xf32> -> vector<16x128xf32>
    %c4 = arith.constant 4 : index
    %c0_23 = arith.constant 0 : index
    %41 = vector.load %arg8[%c4, %c0_23] : memref<19x128xf32, #tpu.memory_space<vmem>>, vector<1x128xf32>
    %42 = vector.broadcast %41 : vector<1x128xf32> to vector<16x128xf32>
    %43 = arith.addf %40, %42 : vector<16x128xf32>
    %cst_24 = arith.constant 0.000000e+00 : f32
    %44 = vector.broadcast %cst_24 : f32 to vector<16x128xf32>
    %45 = arith.maximumf %43, %44 : vector<16x128xf32>
    %c0_25 = arith.constant 0 : index
    %c0_26 = arith.constant 0 : index
    %46 = vector.load %arg3[%c0_25, %c0_26] : memref<2x16xbf16, #tpu.memory_space<vmem>>, vector<2x16xbf16>
    %47 = arith.truncf %45 : vector<16x128xf32> to vector<16x128xbf16>
    %cst_27 = arith.constant dense<0.000000e+00> : vector<2x128xf32>
    %48 = tpu.matmul %46, %47, %cst_27 {dimension_numbers = #tpu.dot_dimension_numbers<[1], [0], [0], [1], [0, 0, 1, 1], [], []>} : vector<2x16xbf16>, vector<16x128xbf16>, vector<2x128xf32> -> vector<2x128xf32>
    %cst_28 = arith.constant 1.250000e-01 : f32
    %49 = vector.broadcast %cst_28 : f32 to vector<2x128xf32>
    %50 = arith.mulf %48, %49 : vector<2x128xf32>
    %51 = arith.truncf %50 : vector<2x128xf32> to vector<2x128xbf16>
    %c640 = arith.constant 640 : index
    %c0_29 = arith.constant 0 : index
    %52 = vector.load %arg7[%c640, %c0_29] : memref<2432x128xbf16, #tpu.memory_space<vmem>>, vector<128x128xbf16>
    %cst_30 = arith.constant dense<0.000000e+00> : vector<2x128xf32>
    %53 = tpu.matmul %51, %52, %cst_30 {dimension_numbers = #tpu.dot_dimension_numbers<[1], [0], [0], [1], [0, 0, 1, 1], [], []>} : vector<2x128xbf16>, vector<128x128xbf16>, vector<2x128xf32> -> vector<2x128xf32>
    %c5 = arith.constant 5 : index
    %c0_31 = arith.constant 0 : index
    %54 = vector.load %arg8[%c5, %c0_31] : memref<19x128xf32, #tpu.memory_space<vmem>>, vector<1x128xf32>
    %55 = vector.broadcast %54 : vector<1x128xf32> to vector<2x128xf32>
    %56 = arith.addf %53, %55 : vector<2x128xf32>
    %57 = arith.truncf %16 : vector<48x128xf32> to vector<48x128xbf16>
    %c768 = arith.constant 768 : index
    %c0_32 = arith.constant 0 : index
    %58 = vector.load %arg7[%c768, %c0_32] : memref<2432x128xbf16, #tpu.memory_space<vmem>>, vector<128x128xbf16>
    %cst_33 = arith.constant dense<0.000000e+00> : vector<48x128xf32>
    %59 = tpu.matmul %57, %58, %cst_33 {dimension_numbers = #tpu.dot_dimension_numbers<[1], [0], [0], [1], [0, 0, 1, 1], [], []>} : vector<48x128xbf16>, vector<128x128xbf16>, vector<48x128xf32> -> vector<48x128xf32>
    %c6 = arith.constant 6 : index
    %c0_34 = arith.constant 0 : index
    %60 = vector.load %arg8[%c6, %c0_34] : memref<19x128xf32, #tpu.memory_space<vmem>>, vector<1x128xf32>
    %61 = vector.broadcast %60 : vector<1x128xf32> to vector<48x128xf32>
    %62 = arith.addf %59, %61 : vector<48x128xf32>
    %63 = vector.extract_strided_slice %19 {offsets = [16, 0], sizes = [48, 128], strides = [1, 1]} : vector<64x128xf32> to vector<48x128xf32>
    %64 = arith.addf %62, %63 : vector<48x128xf32>
    %cst_35 = arith.constant 0.000000e+00 : f32
    %65 = vector.broadcast %cst_35 : f32 to vector<48x128xf32>
    %66 = arith.maximumf %64, %65 : vector<48x128xf32>
    %67 = arith.truncf %66 : vector<48x128xf32> to vector<48x128xbf16>
    %c896 = arith.constant 896 : index
    %c0_36 = arith.constant 0 : index
    %68 = vector.load %arg7[%c896, %c0_36] : memref<2432x128xbf16, #tpu.memory_space<vmem>>, vector<128x128xbf16>
    %cst_37 = arith.constant dense<0.000000e+00> : vector<48x128xf32>
    %69 = tpu.matmul %67, %68, %cst_37 {dimension_numbers = #tpu.dot_dimension_numbers<[1], [0], [0], [1], [0, 0, 1, 1], [], []>} : vector<48x128xbf16>, vector<128x128xbf16>, vector<48x128xf32> -> vector<48x128xf32>
    %c7 = arith.constant 7 : index
    %c0_38 = arith.constant 0 : index
    %70 = vector.load %arg8[%c7, %c0_38] : memref<19x128xf32, #tpu.memory_space<vmem>>, vector<1x128xf32>
    %71 = vector.broadcast %70 : vector<1x128xf32> to vector<48x128xf32>
    %72 = arith.addf %69, %71 : vector<48x128xf32>
    %cst_39 = arith.constant 0.000000e+00 : f32
    %73 = vector.broadcast %cst_39 : f32 to vector<48x128xf32>
    %74 = arith.maximumf %72, %73 : vector<48x128xf32>
    %75 = arith.truncf %74 : vector<48x128xf32> to vector<48x128xbf16>
    %c1024 = arith.constant 1024 : index
    %c0_40 = arith.constant 0 : index
    %76 = vector.load %arg7[%c1024, %c0_40] : memref<2432x128xbf16, #tpu.memory_space<vmem>>, vector<128x128xbf16>
    %cst_41 = arith.constant dense<0.000000e+00> : vector<48x128xf32>
    %77 = tpu.matmul %75, %76, %cst_41 {dimension_numbers = #tpu.dot_dimension_numbers<[1], [0], [0], [1], [0, 0, 1, 1], [], []>} : vector<48x128xbf16>, vector<128x128xbf16>, vector<48x128xf32> -> vector<48x128xf32>
    %c8 = arith.constant 8 : index
    %c0_42 = arith.constant 0 : index
    %78 = vector.load %arg8[%c8, %c0_42] : memref<19x128xf32, #tpu.memory_space<vmem>>, vector<1x128xf32>
    %79 = vector.broadcast %78 : vector<1x128xf32> to vector<48x128xf32>
    %80 = arith.addf %77, %79 : vector<48x128xf32>
    %cst_43 = arith.constant 0.000000e+00 : f32
    %81 = vector.broadcast %cst_43 : f32 to vector<48x128xf32>
    %82 = arith.maximumf %80, %81 : vector<48x128xf32>
    %c0_44 = arith.constant 0 : index
    %c0_45 = arith.constant 0 : index
    %83 = vector.load %arg4[%c0_44, %c0_45] : memref<6x48xbf16, #tpu.memory_space<vmem>>, vector<6x48xbf16>
    %84 = arith.truncf %82 : vector<48x128xf32> to vector<48x128xbf16>
    %cst_46 = arith.constant dense<0.000000e+00> : vector<6x128xf32>
    %85 = tpu.matmul %83, %84, %cst_46 {dimension_numbers = #tpu.dot_dimension_numbers<[1], [0], [0], [1], [0, 0, 1, 1], [], []>} : vector<6x48xbf16>, vector<48x128xbf16>, vector<6x128xf32> -> vector<6x128xf32>
    %cst_47 = arith.constant 1.250000e-01 : f32
    %86 = vector.broadcast %cst_47 : f32 to vector<6x128xf32>
    %87 = arith.mulf %85, %86 : vector<6x128xf32>
    %88 = arith.truncf %87 : vector<6x128xf32> to vector<6x128xbf16>
    %c1152 = arith.constant 1152 : index
    %c0_48 = arith.constant 0 : index
    %89 = vector.load %arg7[%c1152, %c0_48] : memref<2432x128xbf16, #tpu.memory_space<vmem>>, vector<128x128xbf16>
    %cst_49 = arith.constant dense<0.000000e+00> : vector<6x128xf32>
    %90 = tpu.matmul %88, %89, %cst_49 {dimension_numbers = #tpu.dot_dimension_numbers<[1], [0], [0], [1], [0, 0, 1, 1], [], []>} : vector<6x128xbf16>, vector<128x128xbf16>, vector<6x128xf32> -> vector<6x128xf32>
    %c9 = arith.constant 9 : index
    %c0_50 = arith.constant 0 : index
    %91 = vector.load %arg8[%c9, %c0_50] : memref<19x128xf32, #tpu.memory_space<vmem>>, vector<1x128xf32>
    %92 = vector.broadcast %91 : vector<1x128xf32> to vector<6x128xf32>
    %93 = arith.addf %90, %92 : vector<6x128xf32>
    %94 = arith.truncf %93 : vector<6x128xf32> to vector<6x128xbf16>
    %c1280 = arith.constant 1280 : index
    %c0_51 = arith.constant 0 : index
    %95 = vector.load %arg7[%c1280, %c0_51] : memref<2432x128xbf16, #tpu.memory_space<vmem>>, vector<128x128xbf16>
    %cst_52 = arith.constant dense<0.000000e+00> : vector<6x128xf32>
    %96 = tpu.matmul %94, %95, %cst_52 {dimension_numbers = #tpu.dot_dimension_numbers<[1], [0], [0], [1], [0, 0, 1, 1], [], []>} : vector<6x128xbf16>, vector<128x128xbf16>, vector<6x128xf32> -> vector<6x128xf32>
    %c10 = arith.constant 10 : index
    %c0_53 = arith.constant 0 : index
    %97 = vector.load %arg8[%c10, %c0_53] : memref<19x128xf32, #tpu.memory_space<vmem>>, vector<1x128xf32>
    %98 = vector.broadcast %97 : vector<1x128xf32> to vector<6x128xf32>
    %99 = arith.addf %96, %98 : vector<6x128xf32>
    %cst_54 = arith.constant 0.000000e+00 : f32
    %100 = vector.broadcast %cst_54 : f32 to vector<6x128xf32>
    %101 = arith.maximumf %99, %100 : vector<6x128xf32>
    %102 = arith.truncf %101 : vector<6x128xf32> to vector<6x128xbf16>
    %c1408 = arith.constant 1408 : index
    %c0_55 = arith.constant 0 : index
    %103 = vector.load %arg7[%c1408, %c0_55] : memref<2432x128xbf16, #tpu.memory_space<vmem>>, vector<128x128xbf16>
    %cst_56 = arith.constant dense<0.000000e+00> : vector<6x128xf32>
    %104 = tpu.matmul %102, %103, %cst_56 {dimension_numbers = #tpu.dot_dimension_numbers<[1], [0], [0], [1], [0, 0, 1, 1], [], []>} : vector<6x128xbf16>, vector<128x128xbf16>, vector<6x128xf32> -> vector<6x128xf32>
    %c11 = arith.constant 11 : index
    %c0_57 = arith.constant 0 : index
    %105 = vector.load %arg8[%c11, %c0_57] : memref<19x128xf32, #tpu.memory_space<vmem>>, vector<1x128xf32>
    %106 = vector.broadcast %105 : vector<1x128xf32> to vector<6x128xf32>
    %107 = arith.addf %104, %106 : vector<6x128xf32>
    %cst_58 = arith.constant 0.000000e+00 : f32
    %108 = vector.broadcast %cst_58 : f32 to vector<6x128xf32>
    %109 = arith.maximumf %107, %108 : vector<6x128xf32>
    %c0_59 = arith.constant 0 : index
    %c0_60 = arith.constant 0 : index
    %110 = vector.load %arg5[%c0_59, %c0_60] : memref<2x6xbf16, #tpu.memory_space<vmem>>, vector<2x6xbf16>
    %111 = arith.truncf %109 : vector<6x128xf32> to vector<6x128xbf16>
    %cst_61 = arith.constant dense<0.000000e+00> : vector<2x128xf32>
    %112 = tpu.matmul %110, %111, %cst_61 {dimension_numbers = #tpu.dot_dimension_numbers<[1], [0], [0], [1], [0, 0, 1, 1], [], []>} : vector<2x6xbf16>, vector<6x128xbf16>, vector<2x128xf32> -> vector<2x128xf32>
    %cst_62 = arith.constant 0.333333343 : f32
    %113 = vector.broadcast %cst_62 : f32 to vector<2x128xf32>
    %114 = arith.mulf %112, %113 : vector<2x128xf32>
    %115 = arith.truncf %114 : vector<2x128xf32> to vector<2x128xbf16>
    %c1536 = arith.constant 1536 : index
    %c0_63 = arith.constant 0 : index
    %116 = vector.load %arg7[%c1536, %c0_63] : memref<2432x128xbf16, #tpu.memory_space<vmem>>, vector<128x128xbf16>
    %cst_64 = arith.constant dense<0.000000e+00> : vector<2x128xf32>
    %117 = tpu.matmul %115, %116, %cst_64 {dimension_numbers = #tpu.dot_dimension_numbers<[1], [0], [0], [1], [0, 0, 1, 1], [], []>} : vector<2x128xbf16>, vector<128x128xbf16>, vector<2x128xf32> -> vector<2x128xf32>
    %c12 = arith.constant 12 : index
    %c0_65 = arith.constant 0 : index
    %118 = vector.load %arg8[%c12, %c0_65] : memref<19x128xf32, #tpu.memory_space<vmem>>, vector<1x128xf32>
    %119 = vector.broadcast %118 : vector<1x128xf32> to vector<2x128xf32>
    %120 = arith.addf %117, %119 : vector<2x128xf32>
    %121 = arith.addf %56, %120 : vector<2x128xf32>
    %c0_66 = arith.constant 0 : index
    %c0_67 = arith.constant 0 : index
    %122 = vector.load %arg6[%c0_66, %c0_67] : memref<32x2xbf16, #tpu.memory_space<vmem>>, vector<32x2xbf16>
    %123 = arith.truncf %121 : vector<2x128xf32> to vector<2x128xbf16>
    %cst_68 = arith.constant dense<0.000000e+00> : vector<32x128xf32>
    %124 = tpu.matmul %122, %123, %cst_68 {dimension_numbers = #tpu.dot_dimension_numbers<[1], [0], [0], [1], [0, 0, 1, 1], [], []>} : vector<32x2xbf16>, vector<2x128xbf16>, vector<32x128xf32> -> vector<32x128xf32>
    %125 = arith.truncf %17 : vector<32x128xf32> to vector<32x128xbf16>
    %c1664 = arith.constant 1664 : index
    %c0_69 = arith.constant 0 : index
    %126 = vector.load %arg7[%c1664, %c0_69] : memref<2432x128xbf16, #tpu.memory_space<vmem>>, vector<128x128xbf16>
    %cst_70 = arith.constant dense<0.000000e+00> : vector<32x128xf32>
    %127 = tpu.matmul %125, %126, %cst_70 {dimension_numbers = #tpu.dot_dimension_numbers<[1], [0], [0], [1], [0, 0, 1, 1], [], []>} : vector<32x128xbf16>, vector<128x128xbf16>, vector<32x128xf32> -> vector<32x128xf32>
    %c13 = arith.constant 13 : index
    %c0_71 = arith.constant 0 : index
    %128 = vector.load %arg8[%c13, %c0_71] : memref<19x128xf32, #tpu.memory_space<vmem>>, vector<1x128xf32>
    %129 = vector.broadcast %128 : vector<1x128xf32> to vector<32x128xf32>
    %130 = arith.addf %127, %129 : vector<32x128xf32>
    %131 = arith.addf %130, %124 : vector<32x128xf32>
    %cst_72 = arith.constant 0.000000e+00 : f32
    %132 = vector.broadcast %cst_72 : f32 to vector<32x128xf32>
    %133 = arith.maximumf %131, %132 : vector<32x128xf32>
    %134 = arith.truncf %133 : vector<32x128xf32> to vector<32x128xbf16>
    %c1792 = arith.constant 1792 : index
    %c0_73 = arith.constant 0 : index
    %135 = vector.load %arg7[%c1792, %c0_73] : memref<2432x128xbf16, #tpu.memory_space<vmem>>, vector<128x128xbf16>
    %cst_74 = arith.constant dense<0.000000e+00> : vector<32x128xf32>
    %136 = tpu.matmul %134, %135, %cst_74 {dimension_numbers = #tpu.dot_dimension_numbers<[1], [0], [0], [1], [0, 0, 1, 1], [], []>} : vector<32x128xbf16>, vector<128x128xbf16>, vector<32x128xf32> -> vector<32x128xf32>
    %c14 = arith.constant 14 : index
    %c0_75 = arith.constant 0 : index
    %137 = vector.load %arg8[%c14, %c0_75] : memref<19x128xf32, #tpu.memory_space<vmem>>, vector<1x128xf32>
    %138 = vector.broadcast %137 : vector<1x128xf32> to vector<32x128xf32>
    %139 = arith.addf %136, %138 : vector<32x128xf32>
    %cst_76 = arith.constant 0.000000e+00 : f32
    %140 = vector.broadcast %cst_76 : f32 to vector<32x128xf32>
    %141 = arith.maximumf %139, %140 : vector<32x128xf32>
    %142 = arith.truncf %141 : vector<32x128xf32> to vector<32x128xbf16>
    %c1920 = arith.constant 1920 : index
    %c0_77 = arith.constant 0 : index
    %143 = vector.load %arg7[%c1920, %c0_77] : memref<2432x128xbf16, #tpu.memory_space<vmem>>, vector<128x128xbf16>
    %cst_78 = arith.constant dense<0.000000e+00> : vector<32x128xf32>
    %144 = tpu.matmul %142, %143, %cst_78 {dimension_numbers = #tpu.dot_dimension_numbers<[1], [0], [0], [1], [0, 0, 1, 1], [], []>} : vector<32x128xbf16>, vector<128x128xbf16>, vector<32x128xf32> -> vector<32x128xf32>
    %c15 = arith.constant 15 : index
    %c0_79 = arith.constant 0 : index
    %145 = vector.load %arg8[%c15, %c0_79] : memref<19x128xf32, #tpu.memory_space<vmem>>, vector<1x128xf32>
    %146 = vector.broadcast %145 : vector<1x128xf32> to vector<32x128xf32>
    %147 = arith.addf %144, %146 : vector<32x128xf32>
    %cst_80 = arith.constant 0.000000e+00 : f32
    %148 = vector.broadcast %cst_80 : f32 to vector<32x128xf32>
    %149 = arith.maximumf %147, %148 : vector<32x128xf32>
    %150 = arith.truncf %149 : vector<32x128xf32> to vector<32x128xbf16>
    %c2048 = arith.constant 2048 : index
    %c0_81 = arith.constant 0 : index
    %151 = vector.load %arg7[%c2048, %c0_81] : memref<2432x128xbf16, #tpu.memory_space<vmem>>, vector<128x128xbf16>
    %cst_82 = arith.constant dense<0.000000e+00> : vector<32x128xf32>
    %152 = tpu.matmul %150, %151, %cst_82 {dimension_numbers = #tpu.dot_dimension_numbers<[1], [0], [0], [1], [0, 0, 1, 1], [], []>} : vector<32x128xbf16>, vector<128x128xbf16>, vector<32x128xf32> -> vector<32x128xf32>
    %c16 = arith.constant 16 : index
    %c0_83 = arith.constant 0 : index
    %153 = vector.load %arg8[%c16, %c0_83] : memref<19x128xf32, #tpu.memory_space<vmem>>, vector<1x128xf32>
    %154 = vector.broadcast %153 : vector<1x128xf32> to vector<32x128xf32>
    %155 = arith.addf %152, %154 : vector<32x128xf32>
    %cst_84 = arith.constant 0.000000e+00 : f32
    %156 = vector.broadcast %cst_84 : f32 to vector<32x128xf32>
    %157 = arith.maximumf %155, %156 : vector<32x128xf32>
    %158 = arith.truncf %157 : vector<32x128xf32> to vector<32x128xbf16>
    %c2176 = arith.constant 2176 : index
    %c0_85 = arith.constant 0 : index
    %159 = vector.load %arg7[%c2176, %c0_85] : memref<2432x128xbf16, #tpu.memory_space<vmem>>, vector<128x128xbf16>
    %cst_86 = arith.constant dense<0.000000e+00> : vector<32x128xf32>
    %160 = tpu.matmul %158, %159, %cst_86 {dimension_numbers = #tpu.dot_dimension_numbers<[1], [0], [0], [1], [0, 0, 1, 1], [], []>} : vector<32x128xbf16>, vector<128x128xbf16>, vector<32x128xf32> -> vector<32x128xf32>
    %c17 = arith.constant 17 : index
    %c0_87 = arith.constant 0 : index
    %161 = vector.load %arg8[%c17, %c0_87] : memref<19x128xf32, #tpu.memory_space<vmem>>, vector<1x128xf32>
    %162 = vector.broadcast %161 : vector<1x128xf32> to vector<32x128xf32>
    %163 = arith.addf %160, %162 : vector<32x128xf32>
    %cst_88 = arith.constant 0.000000e+00 : f32
    %164 = vector.broadcast %cst_88 : f32 to vector<32x128xf32>
    %165 = arith.maximumf %163, %164 : vector<32x128xf32>
    %166 = arith.truncf %165 : vector<32x128xf32> to vector<32x128xbf16>
    %c2304 = arith.constant 2304 : index
    %c0_89 = arith.constant 0 : index
    %167 = vector.load %arg7[%c2304, %c0_89] : memref<2432x128xbf16, #tpu.memory_space<vmem>>, vector<128x128xbf16>
    %cst_90 = arith.constant dense<0.000000e+00> : vector<32x128xf32>
    %168 = tpu.matmul %166, %167, %cst_90 {dimension_numbers = #tpu.dot_dimension_numbers<[1], [0], [0], [1], [0, 0, 1, 1], [], []>} : vector<32x128xbf16>, vector<128x128xbf16>, vector<32x128xf32> -> vector<32x128xf32>
    %c18 = arith.constant 18 : index
    %c0_91 = arith.constant 0 : index
    %169 = vector.load %arg8[%c18, %c0_91] : memref<19x128xf32, #tpu.memory_space<vmem>>, vector<1x128xf32>
    %170 = vector.broadcast %169 : vector<1x128xf32> to vector<32x128xf32>
    %171 = arith.addf %168, %170 : vector<32x128xf32>
    %c0_92 = arith.constant 0 : index
    %c0_93 = arith.constant 0 : index
    %c0_94 = arith.constant 0 : index
    %172 = vector.load %arg9[%c0_92, %c0_93, %c0_94] : memref<1x32x128xf32, #tpu.memory_space<vmem>>, vector<1x32x128xf32>
    %173 = vector.shape_cast %172 : vector<1x32x128xf32> to vector<32x128xf32>
    %174 = vector.shape_cast %171 : vector<32x128xf32> to vector<1x32x128xf32>
    tpu.vector_store %arg9[%c0_92, %c0_93, %c0_94], %174 {strides = array<i32>} : memref<1x32x128xf32, #tpu.memory_space<vmem>>, vector<1x32x128xf32>,
    %175 = vector.extract_strided_slice %171 {offsets = [0, 1], sizes = [32, 1], strides = [1, 1]} : vector<32x128xf32> to vector<32x1xf32>
    %cst_95 = arith.constant 0.000000e+00 : f32
    %176 = vector.broadcast %cst_95 : f32 to vector<32x1xf32>
    %177 = arith.maximumf %175, %176 : vector<32x1xf32>
    %178 = math.absf %175 : vector<32x1xf32>
    %cst_96 = arith.constant 0.000000e+00 : f32
    %179 = vector.broadcast %cst_96 : f32 to vector<32x1xf32>
    %180 = arith.subf %179, %178 : vector<32x1xf32>
    %181 = math.exp %180 : vector<32x1xf32>
    %cst_97 = arith.constant 1.000000e+00 : f32
    %182 = vector.broadcast %cst_97 : f32 to vector<32x1xf32>
    %183 = arith.addf %182, %181 : vector<32x1xf32>
    %184 = math.log %183 : vector<32x1xf32>
    %185 = arith.addf %177, %184 : vector<32x1xf32>
    %cst_98 = arith.constant 9.900000e-01 : f32
    %186 = vector.broadcast %cst_98 : f32 to vector<32x1xf32>
    %187 = arith.mulf %186, %185 : vector<32x1xf32>
    %cst_99 = arith.constant 0.00999999977 : f32
    %188 = vector.broadcast %cst_99 : f32 to vector<32x1xf32>
    %189 = arith.addf %188, %187 : vector<32x1xf32>
    %c0_100 = arith.constant 0 : index
    %c0_101 = arith.constant 0 : index
    %c1_102 = arith.constant 1 : index
    %190 = vector.load %arg9[%c0_100, %c0_101, %c1_102] : memref<1x32x128xf32, #tpu.memory_space<vmem>>, vector<1x32x1xf32>
    %191 = vector.shape_cast %190 : vector<1x32x1xf32> to vector<32x1xf32>
    %192 = vector.shape_cast %189 : vector<32x1xf32> to vector<1x32x1xf32>
    tpu.vector_store %arg9[%c0_100, %c0_101, %c1_102], %192 {strides = array<i32>} : memref<1x32x128xf32, #tpu.memory_space<vmem>>, vector<1x32x1xf32>,
    return
  }
  func.func @transform_0(%arg0: i32) -> (i32, i32, i32) {
    %c0_i32 = arith.constant 0 : i32
    %c0_i32_0 = arith.constant 0 : i32
    %c0_i32_1 = arith.constant 0 : i32
    return %arg0, %c0_i32, %c0_i32_0 : i32, i32, i32
  }
  func.func @transform_1(%arg0: i32) -> (i32, i32, i32) {
    %c0_i32 = arith.constant 0 : i32
    %c0_i32_0 = arith.constant 0 : i32
    %c0_i32_1 = arith.constant 0 : i32
    return %arg0, %c0_i32, %c0_i32_0 : i32, i32, i32
  }
  func.func @transform_2(%arg0: i32) -> (i32, i32) {
    %c0_i32 = arith.constant 0 : i32
    %c0_i32_0 = arith.constant 0 : i32
    %c0_i32_1 = arith.constant 0 : i32
    return %c0_i32, %c0_i32_0 : i32, i32
  }
  func.func @transform_3(%arg0: i32) -> (i32, i32) {
    %c0_i32 = arith.constant 0 : i32
    %c0_i32_0 = arith.constant 0 : i32
    %c0_i32_1 = arith.constant 0 : i32
    return %c0_i32, %c0_i32_0 : i32, i32
  }
  func.func @transform_4(%arg0: i32) -> (i32, i32) {
    %c0_i32 = arith.constant 0 : i32
    %c0_i32_0 = arith.constant 0 : i32
    %c0_i32_1 = arith.constant 0 : i32
    return %c0_i32, %c0_i32_0 : i32, i32
  }
  func.func @transform_5(%arg0: i32) -> (i32, i32) {
    %c0_i32 = arith.constant 0 : i32
    %c0_i32_0 = arith.constant 0 : i32
    %c0_i32_1 = arith.constant 0 : i32
    return %c0_i32, %c0_i32_0 : i32, i32
  }
  func.func @transform_6(%arg0: i32) -> (i32, i32) {
    %c0_i32 = arith.constant 0 : i32
    %c0_i32_0 = arith.constant 0 : i32
    %c0_i32_1 = arith.constant 0 : i32
    return %c0_i32, %c0_i32_0 : i32, i32
  }
  func.func @transform_7(%arg0: i32) -> (i32, i32) {
    %c0_i32 = arith.constant 0 : i32
    %c0_i32_0 = arith.constant 0 : i32
    %c0_i32_1 = arith.constant 0 : i32
    return %c0_i32, %c0_i32_0 : i32, i32
  }
  func.func @transform_8(%arg0: i32) -> (i32, i32, i32) {
    %c0_i32 = arith.constant 0 : i32
    %c0_i32_0 = arith.constant 0 : i32
    %c0_i32_1 = arith.constant 0 : i32
    return %arg0, %c0_i32, %c0_i32_0 : i32, i32, i32
  }
}

</mosaic_0001>

<bundles_post_ra>
// kernel: tpu_custom_call.1
= control target key start
LH: loop header
LB: loop body
LE: loop exit
PB: predicated region body
PF: predicated region fallthrough
CT: control target
= control target key end

     0   :  { %13 = vsyncpa [#allocation3], 0  ;;  %s4274_s0 = inlined_call_operand.hbm [shape: bf16[1,96,128], index: 0, kind: input, shape index: {}]   ;;  %s4275_s1 = inlined_call_operand.hbm [shape: f32[1,64,128], index: 1, kind: input, shape index: {}]   ;;  %s4276_s2 = inlined_call_operand.vmem [shape: bf16[2,16], index: 2, kind: input, shape index: {}]   ;;  %s4277_s3 = inlined_call_operand.vmem [shape: bf16[6,48], index: 3, kind: input, shape index: {}]   ;;  %s4278_s4 = inlined_call_operand.hbm [shape: bf16[2,6], index: 4, kind: input, shape index: {}]   ;;  %s4279_s5 = inlined_call_operand.vmem [shape: bf16[32,2], index: 5, kind: input, shape index: {}]   ;;  %s4280_s6 = inlined_call_operand.hbm [shape: bf16[2432,128], index: 6, kind: input, shape index: {}]   ;;  %s4281_s7 = inlined_call_operand.vmem [shape: f32[19,128], index: 7, kind: input, shape index: {}]   ;;  %s4282_s8 = inlined_call_operand.hbm [shape: f32[1,32,128], index: 8, kind: output, shape index: {}]  }
   0x1   :  { %14 = vsyncpa [#allocation6], 0 }
   0x2   :  { %15 = vsyncpa [#allocation9], 0 }
   0x3   :  { %16 = vsyncpa [#allocation4], 0  ;;  %s3933_s27 = smov [#allocation5]  }
   0x4   :  { %s34_s28 = sshll.u32 %s3933_s27, 4  ;;  %s35_s28 = int_to_ptr.vmem [resolvable:$true] %s34_s28 }
   0x5   :  { %s3833_s29 = scalar_lea.vmem %s35_s28, 1024  ;;  %p3838_p1 = scmp.lt.s32.totalorder %s35_s28, %s35_s28 }
   0x6   :  { %p3834_p0 = scmp.ne.s32.totalorder %s35_s28, %s3833_s29  ;;  %p3839_p2 = scmp.lt.s32.totalorder %s3833_s29, %s3833_s29 }
   0x8   :  { %p3840_p3 = por %p3839_p2, %p3838_p1 }
   0xa   :  { %p3841_p4 = pnand %p3840_p3, %p3834_p0 }
   0xc   :  { %3844 = shalt.err (!%p3841_p4)
}
   0xd   :  { %s3934_s30 = smov 128   ;;  %s3935_s9 = smov 8  }
   0xe   :  { %40 = dma.hbm_to_vmem [thread:$0]  %s4275_s1, 1024, %s35_s28, [#allocation6], %s3934_s30, %s3934_s30, %s3935_s9  }
   0xf   :  { %s3936_s12 = smov [#allocation2]  }
  0x10   :  { %s22_s13 = sshll.u32 %s3936_s12, 4  ;;  %s23_s13 = int_to_ptr.vmem [resolvable:$true] %s22_s13 }
  0x11   :  { %s3853_s14 = scalar_lea.vmem %s23_s13, 768  ;;  %p3858_p6 = scmp.lt.s32.totalorder %s23_s13, %s23_s13 }
  0x12   :  { %p3854_p5 = scmp.ne.s32.totalorder %s23_s13, %s3853_s14  ;;  %p3859_p7 = scmp.lt.s32.totalorder %s3853_s14, %s3853_s14 }
  0x14   :  { %p3860_p8 = por %p3859_p7, %p3858_p6 }
  0x16   :  { %p3861_p9 = pnand %p3860_p8, %p3854_p5 }
  0x18   :  { %3864 = shalt.err (!%p3861_p9)
}
  0x19   :  { %s3937_s15 = smov 64   ;;  %s3938_s16 = smov 4  }
  0x1a   :  { %28 = dma.hbm_to_vmem [thread:$0]  %s4274_s0, 768, %s23_s13, [#allocation3], %s3937_s15, %s3937_s15, %s3938_s16  }
  0x1b   :  { %s3939_s19 = smov [#allocation7]   ;;  %s3940_s21 = smov [#allocation8]  }
  0x1c   :  { %s51_s20 = sshll.u32 %s3939_s19, 4  ;;  %s62_s1 = sshll.u32 %s3940_s21, 4  ;;  %s52_s20 = int_to_ptr.vmem [resolvable:$true] %s51_s20  ;;  %s63_s1 = int_to_ptr.vmem [resolvable:$true] %s62_s1 }
  0x1d   :  { %s3873_s22 = scalar_lea.vmem %s52_s20, 16  ;;  %s3877_s23 = scalar_lea.vmem %s52_s20, 32 }
  0x1e   :  { %p3874_p10 = scmp.ne.s32.totalorder %s52_s20, %s3873_s22  ;;  %p3878_p11 = scmp.lt.s32.totalorder %s52_s20, %s52_s20 }
  0x1f   :  { %p3879_p12 = scmp.lt.s32.totalorder %s3877_s23, %s3873_s22 }
  0x21   :  { %p3880_p13 = por %p3879_p12, %p3878_p11 }
  0x23   :  { %p3881_p0 = pnand %p3880_p13, %p3874_p10 }
  0x25   :  { %3884 = shalt.err (!%p3881_p0)
}
  0x26   :  { %54 = dma.hbm_to_vmem [thread:$0]  %s4278_s4, 16, %s52_s20, [#allocation6]  }
  0x27   :  { %s3893_s26 = scalar_lea.vmem %s63_s1, 19456  ;;  %p3898_p2 = scmp.lt.s32.totalorder %s63_s1, %s63_s1 }
  0x28   :  { %p3894_p1 = scmp.ne.s32.totalorder %s63_s1, %s3893_s26  ;;  %p3899_p3 = scmp.lt.s32.totalorder %s3893_s26, %s3893_s26 }
  0x2a   :  { %p3900_p4 = por %p3899_p3, %p3898_p2 }
  0x2c   :  { %p3901_p5 = pnand %p3900_p4, %p3894_p1 }
  0x2e   :  { %3904 = shalt.err (!%p3901_p5)
}
  0x2f   :  { %68 = dma.hbm_to_vmem [thread:$0]  %s4280_s6, 19456, %s63_s1, [#allocation9], %s3937_s15, %s3937_s15, %s3938_s16  }
  0x30   :  { %3925 = dma.done.wait [#allocation3], 768  }
  0x31   :  { %3926 = vsyncadd [#allocation3], 4294966528 }
  0x32   :  { %3927 = dma.done.wait [#allocation6], 1040  }
  0x33   :  { %3928 = vsyncadd [#allocation6], 4294966256 }
  0x34   :  { %3929 = dma.done.wait [#allocation9], 19456  }
  0x35   :  { %3930 = vsyncadd [#allocation9], 4294947840  ;;  %v3649_v0 = vld [vmem:[#allocation8 + $0x38] sm:$0xff]   ;;  %v3650_v1 = vld [vmem:[#allocation8 + $0x30] sm:$0xff]   ;;  %v3941_v21 = vmov 0.0   ;;  %vm3942_vm0 = vmmov 0  }
  0x36   :  { %3189 = vmatprep.subr.bf16.mxu0 %v3649_v0  ;;  %v3651_v2 = vld [vmem:[#allocation8 + $0x28] sm:$0xff]   ;;  %v3652_v3 = vld [vmem:[#allocation8 + $0x20] sm:$0xff]   ;;  %v3659_v5 = vld [vmem:[#allocation8 + $0x78] sm:$0xff]   ;;  %vm801_vm1 = vcmask 130048   ;;  %vm1371_vm2 = vcmask 392192   ;;  %vm1754_vm3 = vcmask 1042432  }
  0x37   :  { %3190 = vmatpush3.bf16.msra.mxu0 %v3649_v0  ;;  %v3657_v4 = vld [vmem:[#allocation2] sm:$0xff]   ;;  %v3653_v7 = vld [vmem:[#allocation8 + $0x18] sm:$0xff]   ;;  %3217 = vmatprep.subr.bf16.mxu1 %v3659_v5  ;;  %v3662_v10 = vld [vmem:[#allocation8 + $0x60] sm:$0xff]   ;;  %vm1750_vm4 = vcmask 48128   ;;  %vm1925_vm5 = vcmask 15360   ;;  %vm1932_vm6 = vcmask 1040384  }
  0x38   :  { %3191 = vmatprep.subr.bf16.mxu0 %v3650_v1  ;;  %3205 = vmatprep.mubr.bf16.mxu0 %v3657_v4  ;;  %v3660_v6 = vld [vmem:[#allocation8 + $0x70] sm:$0xff]   ;;  %v3661_v9 = vld [vmem:[#allocation8 + $0x68] sm:$0xff]   ;;  %v3663_v12 = vld [vmem:[#allocation8 + $0x58] sm:$0xff]   ;;  %vm2777_vm7 = vcmask 15368  }
  0x39   :  { %3218 = vmatpush3.bf16.msra.mxu1 %v3659_v5  ;;  %v3654_v8 = vld [vmem:[#allocation8 + $0x10] sm:$0xff]   ;;  %v3655_v11 = vld [vmem:[#allocation8 + $0x8] sm:$0xff]   ;;  %v3656_v13 = vld [vmem:[#allocation8] sm:$0xff]  }
  0x3a   :  { %3219 = vmatprep.subr.bf16.mxu1 %v3660_v6  ;;  %v3658_v14 = vld [vmem:[#allocation2 + $0x8] sm:$0xff]   ;;  %v3665_v16 = vld [vmem:[#allocation8 + $0x48] sm:$0xff]   ;;  %v3666_v17 = vld [vmem:[#allocation8 + $0x40] sm:$0xff]  }
  0x3b   :  { %3192 = vmatpush3.bf16.msra.mxu0 %v3650_v1  ;;  %v3664_v15 = vld [vmem:[#allocation8 + $0x50] sm:$0xff]   ;;  %v3667_v18 = vld [vmem:[#allocation2 + $0x10] sm:$0xff]   ;;  %v3669_v20 = vld [vmem:[#allocation2 + $0x18] sm:$0xff]  }
  0x3c   :  { %3193 = vmatprep.subr.bf16.mxu0 %v3651_v2  ;;  %v3668_v19 = vld [vmem:[#allocation8 + $0xb8] sm:$0xff]   ;;  %v3671_v22 = vld [vmem:[#allocation2 + $0x20] sm:$0xff]   ;;  %v3674_v26 = vld [vmem:[#allocation8 + $0xa0] sm:$0xff]  }
  0x3d   :  { %3220 = vmatpush3.bf16.msra.mxu1 %v3660_v6  ;;  %v3670_v23 = vld [vmem:[#allocation8 + $0xb0] sm:$0xff]   ;;  %v3672_v24 = vld [vmem:[#allocation8 + $0xa8] sm:$0xff]   ;;  %v3675_v27 = vld [vmem:[#allocation8 + $0x98] sm:$0xff]  }
  0x3e   :  { %3221 = vmatprep.subr.bf16.mxu1 %v3661_v9  ;;  %v3673_v25 = vld [vmem:[#allocation2 + $0x28] sm:$0xff]   ;;  %v2801_v30 = vld [vmem:[%s4281_s7] ss:$0 sm:$0xff]  ;;  %v3678_v45 = vld [vmem:[#allocation8 + $0x80] sm:$0xff]  }
  0x3f   :  { %3194 = vmatpush3.bf16.msra.mxu0 %v3651_v2  ;;  %v3676_v43 = vld [vmem:[#allocation8 + $0x90] sm:$0xff]   ;;  %v3677_v44 = vld [vmem:[#allocation8 + $0x88] sm:$0xff]   ;;  %v3679_v47 = vld [vmem:[#allocation8 + $0xf8] sm:$0xff]  }
  0x40   :  { %3195 = vmatprep.subr.bf16.mxu0 %v3652_v3  ;;  %v3680_v50 = vld [vmem:[#allocation8 + $0xf0] sm:$0xff]   ;;  %v3681_v56 = vld [vmem:[#allocation8 + $0xe8] sm:$0xff]  }
  0x41   :  { %3222 = vmatpush3.bf16.msra.mxu1 %v3661_v9 }
  0x42   :  { %3223 = vmatprep.subr.bf16.mxu1 %v3662_v10 }
  0x43   :  { %3196 = vmatpush3.bf16.msra.mxu0 %v3652_v3  ;;  %v3682_v3 = vld [vmem:[#allocation8 + $0xe0] sm:$0xff]  }
  0x44   :  { %3197 = vmatprep.subr.bf16.mxu0 %v3653_v7 }
  0x45   :  { %3224 = vmatpush3.bf16.msra.mxu1 %v3662_v10 }
  0x46   :  { %3225 = vmatprep.subr.bf16.mxu1 %v3663_v12 }
  0x47   :  { %3198 = vmatpush3.bf16.msra.mxu0 %v3653_v7 }
  0x48   :  { %3199 = vmatprep.subr.bf16.mxu0 %v3654_v8 }
  0x49   :  { %3226 = vmatpush3.bf16.msra.mxu1 %v3663_v12 }
  0x4a   :  { %3227 = vmatprep.subr.bf16.mxu1 %v3664_v15 }
  0x4b   :  { %3200 = vmatpush3.bf16.msra.mxu0 %v3654_v8 }
  0x4c   :  { %3201 = vmatprep.subr.bf16.mxu0 %v3655_v11 }
  0x4d   :  { %3228 = vmatpush3.bf16.msra.mxu1 %v3664_v15 }
  0x4e   :  { %3229 = vmatprep.subr.bf16.mxu1 %v3665_v16 }
  0x4f   :  { %3202 = vmatpush3.bf16.msra.mxu0 %v3655_v11  ;;  %v3683_v11 = vld [vmem:[#allocation8 + $0xd8] sm:$0xff]  }
  0x50   :  { %3203 = vmatprep.subr.bf16.mxu0 %v3656_v13 }
  0x51   :  { %3230 = vmatpush3.bf16.msra.mxu1 %v3665_v16  ;;  %v4029_v16 = vld [vmem:[%s4281_s7 + $0x1] ss:$0 sm:$0xff] }
  0x52   :  { %3231 = vmatprep.subr.bf16.mxu1 %v3666_v17 }
  0x53   :  { %3204 = vmatpush3.bf16.msra.mxu0 %v3656_v13 }
  0x54   :  { %3245 = vmatprep.subr.bf16.mxu0 %v3941_v21 }
  0x55   :  { %3232 = vmatpush3.bf16.msra.mxu1 %v3666_v17 }
  0x56   :  { %3206 = vmatmul.mubr.bf16.vlgmr.msra.gmra.mxu0 %v3658_v14  ;;  %3265 = vmatprep.subr.bf16.mxu1 %v3941_v21 }
  0x57   :  { %3209 = vmatprep.mubr.bf16.mxu0 %v3667_v18  ;;  %3246 = vmatpush3.bf16.msra.mxu0 %v3668_v19 }
  0x58   :  { %3247 = vmatprep.subr.bf16.mxu0 %v3941_v21 }
  0x5b   :  { %3248 = vmatpush3.bf16.msra.mxu0 %v3670_v23 }
  0x5c   :  { %3249 = vmatprep.subr.bf16.mxu0 %v3941_v21 }
  0x5e   :  { %3210 = vmatmul.mubr.bf16.gmra.mxu0 %v3669_v20 }
  0x5f   :  { %3213 = vmatprep.mubr.bf16.mxu0 %v3671_v22  ;;  %3250 = vmatpush3.bf16.msra.mxu0 %v3672_v24 }
  0x60   :  { %3251 = vmatprep.subr.bf16.mxu0 %v3941_v21 }
  0x63   :  { %3252 = vmatpush3.bf16.msra.mxu0 %v3674_v26 }
  0x64   :  { %3253 = vmatprep.subr.bf16.mxu0 %v3941_v21 }
  0x66   :  { %3214 = vmatmul.mubr.bf16.gmra.mxu0 %v3673_v25 }
  0x67   :  { %3254 = vmatpush3.bf16.msra.mxu0 %v3675_v27  ;;  %3261 = vmatprep.mubr.msk.bf16.mxu0 %vm3942_vm0, %v3941_v21  ;;  %v3684_v27 = vld [vmem:[#allocation8 + $0xd0] sm:$0xff]  }
  0x68   :  { %3255 = vmatprep.subr.bf16.mxu0 %v3941_v21 }
  0x6b   :  { %3256 = vmatpush3.bf16.msra.mxu0 %v3676_v43 }
  0x6c   :  { %3257 = vmatprep.subr.bf16.mxu0 %v3941_v21 }
  0x6f   :  { %3258 = vmatpush3.bf16.msra.mxu0 %v3677_v44 }
  0x70   :  { %3259 = vmatprep.subr.bf16.mxu0 %v3941_v21 }
  0x73   :  { %3260 = vmatpush3.bf16.msra.mxu0 %v3678_v45 }
  0x74   :  { %3285 = vmatprep.subr.bf16.mxu0 %v3941_v21 }
 0x116   :  { %v3207_v28 = vpop.f32.mrf.mxu0 }
 0x117   :  { %v244_v34 = vadd.f32 %v3207_v28, %v2801_v30  ;;  %v3685_v28 = vld [vmem:[#allocation8 + $0xc8] sm:$0xff]  }
 0x118   :  { %v235_v29 = vpop.f32.mrf.mxu0 }
 0x119   :  { %v236_v32 = vadd.f32 %v2801_v30, %v235_v29  ;;  %v284_v40 = vmax.f32 %v244_v34, 0.0  ;;  %v3686_v29 = vld [vmem:[#allocation8 + $0xc0] sm:$0xff]  }
 0x11a   :  { %v3208_v31 = vpop.f32.mrf.mxu0 }
 0x11b   :  { %v247_v33 = vadd.f32 %v3208_v31, %v2801_v30  ;;  %v282_v38 = vmax.f32 %v236_v32, 0.0  ;;  %v3688_v32 = vld [vmem:[#allocation8 + $0x130] sm:$0xff]  }
 0x11c   :  { %v238_v35 = vpop.f32.mrf.mxu0 }
 0x11d   :  { %v239_v36 = vadd.f32 %v2801_v30, %v238_v35  ;;  %v285_v37 = vmax.f32 %v247_v33, 0.0 }
 0x11e   :  { %v3211_v46 = vpop.f32.mrf.mxu0 }
 0x11f   :  { %v283_v39 = vmax.f32 %v239_v36, 0.0  ;;  %v295_v42 = vpack.c.bf16 %v285_v37, %v284_v40  ;;  %v260_v48 = vadd.f32 %v3211_v46, %v2801_v30  ;;  %v3689_v37 = vld [vmem:[#allocation8 + $0x128] sm:$0xff]   ;;  %v3691_v46 = vld [vmem:[#allocation8 + $0x118] sm:$0xff]  }
 0x120   :  { %v251_v49 = vpop.f32.mrf.mxu0 }
 0x121   :  { %v294_v41 = vpack.c.bf16 %v283_v39, %v282_v38  ;;  %v252_v51 = vadd.f32 %v2801_v30, %v251_v49  ;;  %v288_v54 = vmax.f32 %v260_v48, 0.0  ;;  %v3692_v48 = vld [vmem:[#allocation8 + $0x110] sm:$0xff]  }
 0x122   :  { %v3212_v52 = vpop.f32.mrf.mxu0  ;;  %v2825_v49 = vld [vmem:[%s4281_s7 + $0x2] ss:$0 sm:$0xff] }
 0x123   :  { %3233 = vmatprep.mubr.bf16.mxu1 %v294_v41  ;;  %v263_v53 = vadd.f32 %v3212_v52, %v2801_v30  ;;  %v286_v57 = vmax.f32 %v252_v51, 0.0  ;;  %v3690_v41 = vld [vmem:[#allocation8 + $0x120] sm:$0xff]  }
 0x124   :  { %3234 = vmatmul.mubr.bf16.vlgmr.msra.gmra.mxu1 %v295_v42  ;;  %v254_v55 = vpop.f32.mrf.mxu0  ;;  %v450_v52 = vld [vmem:[#allocation5] sm:$0xff] }
 0x125   :  { %3266 = vmatpush3.bf16.msra.mxu1 %v3679_v47  ;;  %v289_v58 = vmax.f32 %v263_v53, 0.0  ;;  %v255_v59 = vadd.f32 %v2801_v30, %v254_v55 }
 0x126   :  { %3267 = vmatprep.subr.bf16.mxu1 %v3941_v21  ;;  %v3215_v60 = vpop.f32.mrf.mxu0 }
 0x127   :  { %v287_v61 = vmax.f32 %v255_v59, 0.0  ;;  %v297_v62 = vpack.c.bf16 %v289_v58, %v288_v54  ;;  %v276_v63 = vadd.f32 %v3215_v60, %v2801_v30  ;;  %v451_v54 = vld [vmem:[#allocation5 + $0x8] sm:$0xff] }
 0x128   :  { %v267_v0 = vpop.f32.mrf.mxu0 }
 0x129   :  { %3268 = vmatpush3.bf16.msra.mxu1 %v3680_v50  ;;  %v296_v1 = vpack.c.bf16 %v287_v61, %v286_v57  ;;  %v268_v2 = vadd.f32 %v2801_v30, %v267_v0  ;;  %v292_v6 = vmax.f32 %v276_v63, 0.0  ;;  %v3693_v63 = vld [vmem:[#allocation8 + $0x108] sm:$0xff]   ;;  %v3694_v0 = vld [vmem:[#allocation8 + $0x100] sm:$0xff]  }
 0x12a   :  { %3269 = vmatprep.subr.bf16.mxu1 %v3941_v21  ;;  %v3216_v4 = vpop.f32.mrf.mxu0 }
 0x12b   :  { %v279_v5 = vadd.f32 %v3216_v4, %v2801_v30  ;;  %3237 = vmatprep.mubr.bf16.mxu1 %v296_v1  ;;  %v290_v8 = vmax.f32 %v268_v2, 0.0  ;;  %v2834_v2 = vld [vmem:[%s4281_s7 + $0x3] ss:$0 sm:$0xff] }
 0x12c   :  { %v270_v7 = vpop.f32.mrf.mxu0  ;;  %3238 = vmatmul.mubr.bf16.gmra.mxu1 %v297_v62 }
 0x12d   :  { %3270 = vmatpush3.bf16.msra.mxu1 %v3681_v56  ;;  %v293_v9 = vmax.f32 %v279_v5, 0.0  ;;  %v271_v10 = vadd.f32 %v2801_v30, %v270_v7  ;;  %v3687_v30 = vld [vmem:[#allocation8 + $0x138] sm:$0xff]  }
 0x12e   :  { %3271 = vmatprep.subr.bf16.mxu1 %v3941_v21 }
 0x12f   :  { %v291_v12 = vmax.f32 %v271_v10, 0.0  ;;  %v299_v13 = vpack.c.bf16 %v293_v9, %v292_v6 }
 0x131   :  { %3272 = vmatpush3.bf16.msra.mxu1 %v3682_v3  ;;  %v298_v14 = vpack.c.bf16 %v291_v12, %v290_v8 }
 0x132   :  { %3273 = vmatprep.subr.bf16.mxu1 %v3941_v21 }
 0x133   :  { %3241 = vmatprep.mubr.bf16.mxu1 %v298_v14  ;;  %v3697_v14 = vld [vmem:[#allocation8 + $0x1a8] sm:$0xff]  }
 0x134   :  { %3242 = vmatmul.mubr.bf16.gmra.mxu1 %v299_v13  ;;  %v3696_v13 = vld [vmem:[#allocation8 + $0x1b0] sm:$0xff]  }
 0x135   :  { %3274 = vmatpush3.bf16.msra.mxu1 %v3683_v11  ;;  %3281 = vmatprep.mubr.msk.bf16.mxu1 %vm3942_vm0, %v3941_v21  ;;  %v3695_v11 = vld [vmem:[#allocation8 + $0x1b8] sm:$0xff]  }
 0x136   :  { %3275 = vmatprep.subr.bf16.mxu1 %v3941_v21 }
 0x139   :  { %3276 = vmatpush3.bf16.msra.mxu1 %v3684_v27 }
 0x13a   :  { %3277 = vmatprep.subr.bf16.mxu1 %v3941_v21 }
 0x13d   :  { %3278 = vmatpush3.bf16.msra.mxu1 %v3685_v28 }
 0x13e   :  { %3279 = vmatprep.subr.bf16.mxu1 %v3941_v21 }
 0x141   :  { %3280 = vmatpush3.bf16.msra.mxu1 %v3686_v29 }
 0x142   :  { %3305 = vmatprep.subr.bf16.mxu1 %v3941_v21 }
 0x1e4   :  { %v3235_v15 = vpop.f32.mrf.mxu1 }
 0x1e5   :  { %v4032_v19 = vadd.f32 %v3235_v15, %v4029_v16  ;;  %v3698_v15 = vld [vmem:[#allocation8 + $0x1a0] sm:$0xff]  }
 0x1e6   :  { %v403_v17 = vpop.f32.mrf.mxu1 }
 0x1e7   :  { %v404_v23 = vadd.f32 %v4029_v16, %v403_v17  ;;  %v3699_v17 = vld [vmem:[#allocation8 + $0x198] sm:$0xff]  }
 0x1e8   :  { %v3236_v18 = vpop.f32.mrf.mxu1 }
 0x1e9   :  { %v4035_v20 = vadd.f32 %v3236_v18, %v4029_v16  ;;  %v3700_v18 = vld [vmem:[#allocation8 + $0x190] sm:$0xff]  }
 0x1ea   :  { %v406_v22 = vpop.f32.mrf.mxu1 }
 0x1eb   :  { %v956_v24 = vpack.c.bf16 %v4035_v20, %v4032_v19  ;;  %v407_v25 = vadd.f32 %v4029_v16, %v406_v22  ;;  %v3701_v22 = vld [vmem:[#allocation8 + $0x188] sm:$0xff]   ;;  %v2843_v19 = vld [vmem:[%s4281_s7 + $0x4] ss:$0 sm:$0xff] }
 0x1ec   :  { %v3239_v31 = vpop.f32.mrf.mxu1 }
 0x1ed   :  { %v458_v26 = vpack.c.bf16 %v407_v25, %v404_v23  ;;  %v4050_v34 = vadd.f32 %v3239_v31, %v4029_v16  ;;  %v3702_v23 = vld [vmem:[#allocation8 + $0x180] sm:$0xff]  }
 0x1ee   :  { %v4046_v33 = vpop.f32.mrf.mxu1 }
 0x1ef   :  { %3262 = vmatmul.mubr.bf16.vlgmr.msra.gmra.mxu0 %v458_v26  ;;  %v420_v25 = vadd.f32 %v4029_v16, %v4046_v33 }
 0x1f0   :  { %3301 = vmatprep.mubr.msk.bf16.mxu0 %vm3942_vm0, %v3941_v21  ;;  %3286 = vmatpush3.bf16.msra.mxu0 %v3687_v30  ;;  %v3240_v35 = vpop.f32.mrf.mxu1 }
 0x1f1   :  { %3287 = vmatprep.subr.bf16.mxu0 %v3941_v21  ;;  %v4053_v36 = vadd.f32 %v3240_v35, %v4029_v16 }
 0x1f2   :  { %v4055_v38 = vpop.f32.mrf.mxu1 }
 0x1f3   :  { %v958_v39 = vpack.c.bf16 %v4053_v36, %v4050_v34  ;;  %v423_v26 = vadd.f32 %v4029_v16, %v4055_v38  ;;  %v799_v34 = vld [vmem:[%s4276_s2] sm:$0x1]  ;;  %v3703_v36 = vld [vmem:[#allocation8 + $0x178] sm:$0xff]  }
 0x1f4   :  { %3288 = vmatpush3.bf16.msra.mxu0 %v3688_v32  ;;  %v3243_v40 = vpop.f32.mrf.mxu1  ;;  %v3705_v38 = vld [vmem:[#allocation8 + $0x168] sm:$0xff]  }
 0x1f5   :  { %3289 = vmatprep.subr.bf16.mxu0 %v3941_v21  ;;  %v4064_v43 = vadd.f32 %v3243_v40, %v4029_v16  ;;  %v957_v27 = vpack.c.bf16 %v423_v26, %v420_v25  ;;  %v3707_v40 = vld [vmem:[#allocation8 + $0x158] sm:$0xff]  }
 0x1f6   :  { %v4060_v42 = vpop.f32.mrf.mxu1 }
 0x1f8   :  { %3290 = vmatpush3.bf16.msra.mxu0 %v3689_v37  ;;  %v3244_v44 = vpop.f32.mrf.mxu1  ;;  %v3704_v37 = vld [vmem:[#allocation8 + $0x170] sm:$0xff]  }
 0x1f9   :  { %3291 = vmatprep.subr.bf16.mxu0 %v3941_v21  ;;  %v4067_v45 = vadd.f32 %v3244_v44, %v4029_v16  ;;  %v3708_v44 = vld [vmem:[#allocation8 + $0x150] sm:$0xff]  }
 0x1fa   :  { %v4081_v1 = vpop.f32.mrf.mxu1 }
 0x1fb   :  { %v1986_v47 = vpack.c.bf16 %v4067_v45, %v4064_v43  ;;  %v3775_v43 = vld [vmem:[#allocation8 + $0x388] sm:$0xff]   ;;  %v3776_v45 = vld [vmem:[#allocation8 + $0x380] sm:$0xff]  }
 0x1fc   :  { %3292 = vmatpush3.bf16.msra.mxu0 %v3690_v41  ;;  %v2862_v41 = vld [vmem:[%s4281_s7 + $0x6] ss:$0 sm:$0xff] }
 0x1fd   :  { %3293 = vmatprep.subr.bf16.mxu0 %v3941_v21 }
 0x200   :  { %3294 = vmatpush3.bf16.msra.mxu0 %v3691_v46 }
 0x201   :  { %3295 = vmatprep.subr.bf16.mxu0 %v3941_v21 }
 0x204   :  { %3296 = vmatpush3.bf16.msra.mxu0 %v3692_v48 }
 0x205   :  { %3297 = vmatprep.subr.bf16.mxu0 %v3941_v21 }
 0x208   :  { %3298 = vmatpush3.bf16.msra.mxu0 %v3693_v63 }
 0x209   :  { %3299 = vmatprep.subr.bf16.mxu0 %v3941_v21 }
 0x20c   :  { %3300 = vmatpush3.bf16.msra.mxu0 %v3694_v0 }
 0x20d   :  { %3331 = vmatprep.subr.bf16.mxu0 %v3941_v21 }
 0x2af   :  { %v562_v50 = vpop.f32.mrf.mxu0 }
 0x2b0   :  { %v563_v51 = vadd.f32 %v2825_v49, %v562_v50 }
 0x2b1   :  { %v3263_v53 = vpop.f32.mrf.mxu0 }
 0x2b2   :  { %v569_v56 = vadd.f32 %v563_v51, %v450_v52  ;;  %v3709_v51 = vld [vmem:[#allocation8 + $0x148] sm:$0xff]   ;;  %v453_v52 = vld [vmem:[#allocation5 + $0x18] sm:$0xff] }
 0x2b3   :  { %v565_v55 = vpop.f32.mrf.mxu0 }
 0x2b4   :  { %v566_v57 = vadd.f32 %v2825_v49, %v565_v55  ;;  %v571_v60 = vmax.f32 %v569_v56, 0.0  ;;  %v452_v49 = vld [vmem:[#allocation5 + $0x10] sm:$0xff] }
 0x2b5   :  { %v3264_v58 = vpop.f32.mrf.mxu0 }
 0x2b6   :  { %v570_v59 = vadd.f32 %v566_v57, %v451_v54 }
 0x2b8   :  { %v572_v61 = vmax.f32 %v570_v59, 0.0 }
 0x2ba   :  { %v573_v62 = vpack.c.bf16 %v572_v61, %v571_v60 }
 0x2bc   :  { %3282 = vmatmul.mubr.bf16.vlgmr.msra.gmra.mxu1 %v573_v62  ;;  %v454_v62 = vld [vmem:[#allocation5 + $0x20] sm:$0xff] }
 0x2bd   :  { %3307 = vmatprep.mubr.msk.bf16.mxu1 %vm3942_vm0, %v3941_v21 }
 0x37c   :  { %v677_v3 = vpop.f32.mrf.mxu1 }
 0x37d   :  { %v678_v5 = vadd.f32 %v2834_v2, %v677_v3 }
 0x37e   :  { %v3283_v4 = vpop.f32.mrf.mxu1 }
 0x37f   :  { %v684_v9 = vmax.f32 %v678_v5, 0.0 }
 0x380   :  { %v680_v6 = vpop.f32.mrf.mxu1 }
 0x381   :  { %v681_v7 = vadd.f32 %v2834_v2, %v680_v6  ;;  %v455_v2 = vld [vmem:[#allocation5 + $0x28] sm:$0xff] }
 0x382   :  { %v3284_v8 = vpop.f32.mrf.mxu1 }
 0x383   :  { %v685_v10 = vmax.f32 %v681_v7, 0.0 }
 0x385   :  { %v686_v12 = vpack.c.bf16 %v685_v10, %v684_v9 }
 0x387   :  { %3302 = vmatmul.mubr.bf16.vlgmr.msra.gmra.mxu0 %v686_v12  ;;  %v456_v12 = vld [vmem:[#allocation5 + $0x30] sm:$0xff] }
 0x388   :  { %3332 = vmatpush3.bf16.msra.mxu0 %v3695_v11  ;;  %3347 = vmatprep.mubr.msk.bf16.mxu0 %vm3942_vm0, %v3941_v21 }
 0x389   :  { %3333 = vmatprep.subr.bf16.mxu0 %v3941_v21 }
 0x38c   :  { %3334 = vmatpush3.bf16.msra.mxu0 %v3696_v13 }
 0x38d   :  { %3335 = vmatprep.subr.bf16.mxu0 %v3941_v21 }
 0x390   :  { %3336 = vmatpush3.bf16.msra.mxu0 %v3697_v14 }
 0x391   :  { %3337 = vmatprep.subr.bf16.mxu0 %v3941_v21 }
 0x394   :  { %3338 = vmatpush3.bf16.msra.mxu0 %v3698_v15  ;;  %v457_v15 = vld [vmem:[#allocation5 + $0x38] sm:$0xff] }
 0x395   :  { %3339 = vmatprep.subr.bf16.mxu0 %v3941_v21 }
 0x398   :  { %3340 = vmatpush3.bf16.msra.mxu0 %v3699_v17 }
 0x399   :  { %3341 = vmatprep.subr.bf16.mxu0 %v3941_v21 }
 0x39c   :  { %3342 = vmatpush3.bf16.msra.mxu0 %v3700_v18 }
 0x39d   :  { %3343 = vmatprep.subr.bf16.mxu0 %v3941_v21 }
 0x3a0   :  { %3344 = vmatpush3.bf16.msra.mxu0 %v3701_v22 }
 0x3a1   :  { %3345 = vmatprep.subr.bf16.mxu0 %v3941_v21 }
 0x3a4   :  { %3346 = vmatpush3.bf16.msra.mxu0 %v3702_v23 }
 0x3a5   :  { %3387 = vmatprep.subr.bf16.mxu0 %v3941_v21 }
 0x3a7   :  { %3348 = vmatmul.mubr.bf16.vlgmr.msra.gmra.mxu0 %v956_v24 }
 0x3a8   :  { %3351 = vmatprep.mubr.msk.bf16.mxu0 %vm3942_vm0, %v3941_v21 }
 0x3af   :  { %3352 = vmatmul.mubr.bf16.gmra.mxu0 %v957_v27 }
 0x3b0   :  { %3355 = vmatprep.mubr.msk.bf16.mxu0 %vm3942_vm0, %v3941_v21 }
 0x3b7   :  { %3356 = vmatmul.mubr.bf16.gmra.mxu0 %v958_v39  ;;  %v3706_v39 = vld [vmem:[#allocation8 + $0x160] sm:$0xff]  }
 0x3b8   :  { %3403 = vmatprep.mubr.msk.bf16.mxu0 %vm3942_vm0, %v3941_v21 }
 0x447   :  { %v790_v20 = vpop.f32.mrf.mxu0 }
 0x448   :  { %v791_v28 = vadd.f32 %v2843_v19, %v790_v20  ;;  %v3710_v20 = vld [vmem:[#allocation8 + $0x140] sm:$0xff]  }
 0x449   :  { %v3303_v24 = vpop.f32.mrf.mxu0 }
 0x44a   :  { %v797_v32 = vmax.f32 %v791_v28, 0.0 }
 0x44b   :  { %v793_v29 = vpop.f32.mrf.mxu0 }
 0x44c   :  { %v794_v30 = vadd.f32 %v2843_v19, %v793_v29 }
 0x44d   :  { %v3304_v31 = vpop.f32.mrf.mxu0 }
 0x44e   :  { %v798_v33 = vmax.f32 %v794_v30, 0.0  ;;  %v3711_v30 = vld [vmem:[#allocation8 + $0x1f8] sm:$0xff]  }
 0x450   :  { %v800_v35 = vpack.c.bf16 %v798_v33, %v797_v32 }
 0x452   :  { %3306 = vmatpush3.bf16.msra.mxu1 %v800_v35  ;;  %v3712_v35 = vld [vmem:[#allocation8 + $0x1f0] sm:$0xff]  }
 0x453   :  { %3311 = vmatprep.subr.bf16.mxu1 %v3941_v21 }
 0x455   :  { %3308 = vmatmul.mubr.msk.bf16.vlgmr.msra.gmra.mxu1 %vm801_vm1, %v799_v34  ;;  %v3713_v34 = vld [vmem:[#allocation8 + $0x1e8] sm:$0xff]  }
 0x456   :  { %3312 = vmatpush3.bf16.msra.mxu1 %v3703_v36  ;;  %3327 = vmatprep.mubr.msk.bf16.mxu1 %vm3942_vm0, %v3941_v21  ;;  %v3714_v36 = vld [vmem:[#allocation8 + $0x1e0] sm:$0xff]  }
 0x457   :  { %3313 = vmatprep.subr.bf16.mxu1 %v3941_v21 }
 0x45a   :  { %3314 = vmatpush3.bf16.msra.mxu1 %v3704_v37  ;;  %v3715_v37 = vld [vmem:[#allocation8 + $0x1d8] sm:$0xff]  }
 0x45b   :  { %3315 = vmatprep.subr.bf16.mxu1 %v3941_v21 }
 0x45e   :  { %3316 = vmatpush3.bf16.msra.mxu1 %v3705_v38  ;;  %v3716_v38 = vld [vmem:[#allocation8 + $0x1d0] sm:$0xff]  }
 0x45f   :  { %3317 = vmatprep.subr.bf16.mxu1 %v3941_v21 }
 0x462   :  { %3318 = vmatpush3.bf16.msra.mxu1 %v3706_v39  ;;  %v3717_v39 = vld [vmem:[#allocation8 + $0x1c8] sm:$0xff]  }
 0x463   :  { %3319 = vmatprep.subr.bf16.mxu1 %v3941_v21 }
 0x466   :  { %3320 = vmatpush3.bf16.msra.mxu1 %v3707_v40  ;;  %v3718_v40 = vld [vmem:[#allocation8 + $0x1c0] sm:$0xff]  }
 0x467   :  { %v1062_v46 = vpop.f32.mrf.mxu0  ;;  %3321 = vmatprep.subr.bf16.mxu1 %v3941_v21 }
 0x468   :  { %v1063_v48 = vadd.f32 %v2862_v41, %v1062_v46  ;;  %v3721_v46 = vld [vmem:[#allocation8 + $0x228] sm:$0xff]  }
 0x469   :  { %v3349_v50 = vpop.f32.mrf.mxu0 }
 0x46a   :  { %3322 = vmatpush3.bf16.msra.mxu1 %v3708_v44  ;;  %v1085_v54 = vadd.f32 %v1063_v48, %v452_v49  ;;  %v3720_v44 = vld [vmem:[#allocation8 + $0x230] sm:$0xff]   ;;  %v3722_v48 = vld [vmem:[#allocation8 + $0x220] sm:$0xff]   ;;  %v3723_v49 = vld [vmem:[#allocation8 + $0x218] sm:$0xff]  }
 0x46b   :  { %v1065_v53 = vpop.f32.mrf.mxu0  ;;  %3323 = vmatprep.subr.bf16.mxu1 %v3941_v21  ;;  %v3724_v50 = vld [vmem:[#allocation8 + $0x210] sm:$0xff]  }
 0x46c   :  { %v1066_v55 = vadd.f32 %v2862_v41, %v1065_v53  ;;  %v1091_v59 = vmax.f32 %v1085_v54, 0.0 }
 0x46d   :  { %v3350_v56 = vpop.f32.mrf.mxu0 }
 0x46e   :  { %v1086_v57 = vadd.f32 %v1066_v55, %v453_v52  ;;  %3324 = vmatpush3.bf16.msra.mxu1 %v3709_v51  ;;  %v3725_v51 = vld [vmem:[#allocation8 + $0x208] sm:$0xff]   ;;  %v3726_v52 = vld [vmem:[#allocation8 + $0x200] sm:$0xff]  }
 0x46f   :  { %v1070_v58 = vpop.f32.mrf.mxu0  ;;  %3325 = vmatprep.subr.bf16.mxu1 %v3941_v21 }
 0x470   :  { %v1092_v60 = vmax.f32 %v1086_v57, 0.0  ;;  %v1071_v61 = vadd.f32 %v2862_v41, %v1070_v58  ;;  %v2871_v57 = vld [vmem:[%s4281_s7 + $0x7] ss:$0 sm:$0xff] }
 0x471   :  { %v3353_v63 = vpop.f32.mrf.mxu0 }
 0x472   :  { %v1097_v0 = vpack.c.bf16 %v1092_v60, %v1091_v59  ;;  %v1087_v4 = vadd.f32 %v1071_v61, %v454_v62  ;;  %3326 = vmatpush3.bf16.msra.mxu1 %v3710_v20  ;;  %v3729_v20 = vld [vmem:[#allocation8 + $0x268] sm:$0xff]  }
 0x473   :  { %v1073_v3 = vpop.f32.mrf.mxu0  ;;  %3359 = vmatprep.subr.bf16.mxu1 %v3941_v21 }
 0x474   :  { %v1074_v5 = vadd.f32 %v2862_v41, %v1073_v3  ;;  %v1093_v9 = vmax.f32 %v1087_v4, 0.0 }
 0x475   :  { %v3354_v6 = vpop.f32.mrf.mxu0 }
 0x476   :  { %v1088_v7 = vadd.f32 %v1074_v5, %v455_v2 }
 0x477   :  { %v1078_v8 = vpop.f32.mrf.mxu0 }
 0x478   :  { %v1094_v10 = vmax.f32 %v1088_v7, 0.0  ;;  %v1079_v11 = vadd.f32 %v2862_v41, %v1078_v8 }
 0x479   :  { %v3357_v13 = vpop.f32.mrf.mxu0 }
 0x47a   :  { %v1098_v14 = vpack.c.bf16 %v1094_v10, %v1093_v9  ;;  %v1089_v18 = vadd.f32 %v1079_v11, %v456_v12 }
 0x47b   :  { %v1081_v17 = vpop.f32.mrf.mxu0 }
 0x47c   :  { %v1082_v22 = vadd.f32 %v2862_v41, %v1081_v17  ;;  %v1095_v26 = vmax.f32 %v1089_v18, 0.0  ;;  %v3719_v41 = vld [vmem:[#allocation8 + $0x238] sm:$0xff]  }
 0x47d   :  { %v3358_v23 = vpop.f32.mrf.mxu0  ;;  %3388 = vmatpush3.bf16.msra.mxu0 %v3719_v41 }
 0x47e   :  { %v1090_v25 = vadd.f32 %v1082_v22, %v457_v15  ;;  %3389 = vmatprep.subr.bf16.mxu0 %v3941_v21 }
 0x480   :  { %v1096_v27 = vmax.f32 %v1090_v25, 0.0 }
 0x481   :  { %3390 = vmatpush3.bf16.msra.mxu0 %v3720_v44 }
 0x482   :  { %v1099_v19 = vpack.c.bf16 %v1096_v27, %v1095_v26  ;;  %3391 = vmatprep.subr.bf16.mxu0 %v3941_v21  ;;  %v3727_v27 = vld [vmem:[#allocation8 + $0x278] sm:$0xff]  }
 0x485   :  { %3392 = vmatpush3.bf16.msra.mxu0 %v3721_v46 }
 0x486   :  { %3393 = vmatprep.subr.bf16.mxu0 %v3941_v21 }
 0x489   :  { %3394 = vmatpush3.bf16.msra.mxu0 %v3722_v48 }
 0x48a   :  { %3395 = vmatprep.subr.bf16.mxu0 %v3941_v21 }
 0x48d   :  { %3396 = vmatpush3.bf16.msra.mxu0 %v3723_v49 }
 0x48e   :  { %3397 = vmatprep.subr.bf16.mxu0 %v3941_v21 }
 0x491   :  { %3398 = vmatpush3.bf16.msra.mxu0 %v3724_v50 }
 0x492   :  { %3399 = vmatprep.subr.bf16.mxu0 %v3941_v21 }
 0x495   :  { %3400 = vmatpush3.bf16.msra.mxu0 %v3725_v51 }
 0x496   :  { %3401 = vmatprep.subr.bf16.mxu0 %v3941_v21 }
 0x499   :  { %3402 = vmatpush3.bf16.msra.mxu0 %v3726_v52 }
 0x49a   :  { %3425 = vmatprep.subr.bf16.mxu0 %v3941_v21 }
 0x515   :  { %v839_v24 = vpop.f32.mrf.mxu1 }
 0x516   :  { %v845_v28 = vmul.f32 0.125, %v839_v24  ;;  %v3730_v24 = vld [vmem:[#allocation8 + $0x260] sm:$0xff]  }
 0x517   :  { %v3309_v29 = vpop.f32.mrf.mxu1 }
 0x518   :  { %v846_v31 = vpack.c.bf16 %v845_v28, %v845_v28  ;;  %v3731_v28 = vld [vmem:[#allocation8 + $0x258] sm:$0xff]   ;;  %v3732_v29 = vld [vmem:[#allocation8 + $0x250] sm:$0xff]  }
 0x519   :  { %v842_v32 = vpop.f32.mrf.mxu1 }
 0x51a   :  { %3328 = vmatmul.mubr.bf16.vlgmr.msra.gmra.mxu1 %v846_v31 }
 0x51b   :  { %3360 = vmatpush3.bf16.msra.mxu1 %v3711_v30  ;;  %v3310_v33 = vpop.f32.mrf.mxu1  ;;  %3375 = vmatprep.mubr.msk.bf16.mxu1 %vm3942_vm0, %v3941_v21  ;;  %v3733_v30 = vld [vmem:[#allocation8 + $0x248] sm:$0xff]  }
 0x51c   :  { %3361 = vmatprep.subr.bf16.mxu1 %v3941_v21 }
 0x51f   :  { %3362 = vmatpush3.bf16.msra.mxu1 %v3712_v35 }
 0x520   :  { %3363 = vmatprep.subr.bf16.mxu1 %v3941_v21 }
 0x523   :  { %3364 = vmatpush3.bf16.msra.mxu1 %v3713_v34 }
 0x524   :  { %3365 = vmatprep.subr.bf16.mxu1 %v3941_v21 }
 0x527   :  { %3366 = vmatpush3.bf16.msra.mxu1 %v3714_v36 }
 0x528   :  { %3367 = vmatprep.subr.bf16.mxu1 %v3941_v21 }
 0x52b   :  { %3368 = vmatpush3.bf16.msra.mxu1 %v3715_v37 }
 0x52c   :  { %3369 = vmatprep.subr.bf16.mxu1 %v3941_v21 }
 0x52f   :  { %3370 = vmatpush3.bf16.msra.mxu1 %v3716_v38 }
 0x530   :  { %3371 = vmatprep.subr.bf16.mxu1 %v3941_v21 }
 0x533   :  { %3372 = vmatpush3.bf16.msra.mxu1 %v3717_v39 }
 0x534   :  { %3373 = vmatprep.subr.bf16.mxu1 %v3941_v21 }
 0x537   :  { %3374 = vmatpush3.bf16.msra.mxu1 %v3718_v40  ;;  %v2880_v40 = vld [vmem:[%s4281_s7 + $0x8] ss:$0 sm:$0xff] }
 0x538   :  { %3415 = vmatprep.subr.bf16.mxu1 %v3941_v21 }
 0x53a   :  { %3376 = vmatmul.mubr.bf16.vlgmr.msra.gmra.mxu1 %v1097_v0 }
 0x53b   :  { %3379 = vmatprep.mubr.msk.bf16.mxu1 %vm3942_vm0, %v3941_v21 }
 0x542   :  { %3380 = vmatmul.mubr.bf16.gmra.mxu1 %v1098_v14 }
 0x543   :  { %3383 = vmatprep.mubr.msk.bf16.mxu1 %vm3942_vm0, %v3941_v21 }
 0x54a   :  { %3384 = vmatmul.mubr.bf16.gmra.mxu1 %v1099_v19  ;;  %v3728_v19 = vld [vmem:[#allocation8 + $0x270] sm:$0xff]  }
 0x54b   :  { %3421 = vmatprep.mubr.msk.bf16.mxu1 %vm3942_vm0, %v3941_v21 }
 0x5da   :  { %v4156_v53 = vpop.f32.mrf.mxu1 }
 0x5dc   :  { %v3329_v54 = vpop.f32.mrf.mxu1 }
 0x5de   :  { %v953_v55 = vpop.f32.mrf.mxu1 }
 0x5e0   :  { %v3330_v56 = vpop.f32.mrf.mxu1 }
 0x5fa   :  { %v1203_v58 = vpop.f32.mrf.mxu1 }
 0x5fb   :  { %v1204_v60 = vadd.f32 %v2871_v57, %v1203_v58 }
 0x5fc   :  { %v3377_v59 = vpop.f32.mrf.mxu1 }
 0x5fd   :  { %v1226_v0 = vmax.f32 %v1204_v60, 0.0 }
 0x5fe   :  { %v1206_v61 = vpop.f32.mrf.mxu1 }
 0x5ff   :  { %v1207_v62 = vadd.f32 %v2871_v57, %v1206_v61 }
 0x600   :  { %v3378_v63 = vpop.f32.mrf.mxu1 }
 0x601   :  { %v1227_v2 = vmax.f32 %v1207_v62, 0.0 }
 0x602   :  { %v1211_v3 = vpop.f32.mrf.mxu1 }
 0x603   :  { %v1232_v4 = vpack.c.bf16 %v1227_v2, %v1226_v0  ;;  %v1212_v6 = vadd.f32 %v2871_v57, %v1211_v3  ;;  %v1367_v0 = vld [vmem:[%s4277_s3] sm:$0x7]  ;;  %v3734_v2 = vld [vmem:[#allocation8 + $0x240] sm:$0xff]   ;;  %v3735_v3 = vld [vmem:[#allocation8 + $0x2b8] sm:$0xff]  }
 0x604   :  { %v3381_v5 = vpop.f32.mrf.mxu1 }
 0x605   :  { %3404 = vmatmul.mubr.bf16.vlgmr.msra.gmra.mxu0 %v1232_v4  ;;  %v1228_v10 = vmax.f32 %v1212_v6, 0.0  ;;  %v3736_v4 = vld [vmem:[#allocation8 + $0x2b0] sm:$0xff]   ;;  %v3737_v5 = vld [vmem:[#allocation8 + $0x2a8] sm:$0xff]   ;;  %v3738_v6 = vld [vmem:[#allocation8 + $0x2a0] sm:$0xff]  }
 0x606   :  { %v1214_v7 = vpop.f32.mrf.mxu1  ;;  %3407 = vmatprep.mubr.msk.bf16.mxu0 %vm3942_vm0, %v3941_v21  ;;  %3426 = vmatpush3.bf16.msra.mxu0 %v3727_v27  ;;  %v3748_v27 = vld [vmem:[#allocation8 + $0x2d0] sm:$0xff]  }
 0x607   :  { %v1215_v8 = vadd.f32 %v2871_v57, %v1214_v7  ;;  %3427 = vmatprep.subr.bf16.mxu0 %v3941_v21  ;;  %v3739_v7 = vld [vmem:[#allocation8 + $0x298] sm:$0xff]  }
 0x608   :  { %v3382_v9 = vpop.f32.mrf.mxu1 }
 0x609   :  { %v1229_v11 = vmax.f32 %v1215_v8, 0.0  ;;  %v3740_v8 = vld [vmem:[#allocation8 + $0x290] sm:$0xff]   ;;  %v3741_v9 = vld [vmem:[#allocation8 + $0x288] sm:$0xff]  }
 0x60a   :  { %v1219_v12 = vpop.f32.mrf.mxu1  ;;  %3428 = vmatpush3.bf16.msra.mxu0 %v3728_v19  ;;  %v2890_v19 = vld [vmem:[%s4281_s7 + $0x9] ss:$0 sm:$0xff] }
 0x60b   :  { %v1233_v13 = vpack.c.bf16 %v1229_v11, %v1228_v10  ;;  %v1220_v15 = vadd.f32 %v2871_v57, %v1219_v12  ;;  %3429 = vmatprep.subr.bf16.mxu0 %v3941_v21 }
 0x60c   :  { %v3385_v14 = vpop.f32.mrf.mxu1 }
 0x60d   :  { %3408 = vmatmul.mubr.bf16.gmra.mxu0 %v1233_v13  ;;  %v1230_v23 = vmax.f32 %v1220_v15, 0.0 }
 0x60e   :  { %v1222_v17 = vpop.f32.mrf.mxu1  ;;  %3411 = vmatprep.mubr.msk.bf16.mxu0 %vm3942_vm0, %v3941_v21  ;;  %3430 = vmatpush3.bf16.msra.mxu0 %v3729_v20 }
 0x60f   :  { %v1223_v18 = vadd.f32 %v2871_v57, %v1222_v17  ;;  %3431 = vmatprep.subr.bf16.mxu0 %v3941_v21  ;;  %v3742_v17 = vld [vmem:[#allocation8 + $0x280] sm:$0xff]  }
 0x610   :  { %v3386_v22 = vpop.f32.mrf.mxu1 }
 0x611   :  { %v1231_v25 = vmax.f32 %v1223_v18, 0.0  ;;  %v3743_v18 = vld [vmem:[#allocation8 + $0x2f8] sm:$0xff]   ;;  %v3744_v22 = vld [vmem:[#allocation8 + $0x2f0] sm:$0xff]  }
 0x612   :  { %3432 = vmatpush3.bf16.msra.mxu0 %v3730_v24 }
 0x613   :  { %v1234_v26 = vpack.c.bf16 %v1231_v25, %v1230_v23  ;;  %3433 = vmatprep.subr.bf16.mxu0 %v3941_v21  ;;  %v3745_v23 = vld [vmem:[#allocation8 + $0x2e8] sm:$0xff]   ;;  %v3746_v25 = vld [vmem:[#allocation8 + $0x2e0] sm:$0xff]  }
 0x615   :  { %3412 = vmatmul.mubr.bf16.gmra.mxu0 %v1234_v26  ;;  %v3747_v26 = vld [vmem:[#allocation8 + $0x2d8] sm:$0xff]  }
 0x616   :  { %3441 = vmatprep.mubr.msk.bf16.mxu0 %vm3942_vm0, %v3941_v21  ;;  %3434 = vmatpush3.bf16.msra.mxu0 %v3731_v28 }
 0x617   :  { %3435 = vmatprep.subr.bf16.mxu0 %v3941_v21 }
 0x61a   :  { %3436 = vmatpush3.bf16.msra.mxu0 %v3732_v29 }
 0x61b   :  { %3437 = vmatprep.subr.bf16.mxu0 %v3941_v21 }
 0x61e   :  { %3438 = vmatpush3.bf16.msra.mxu0 %v3733_v30 }
 0x61f   :  { %3439 = vmatprep.subr.bf16.mxu0 %v3941_v21 }
 0x622   :  { %3440 = vmatpush3.bf16.msra.mxu0 %v3734_v2 }
 0x623   :  { %3465 = vmatprep.subr.bf16.mxu0 %v3941_v21 }
 0x6c5   :  { %v1338_v31 = vpop.f32.mrf.mxu0 }
 0x6c6   :  { %v1339_v58 = vadd.f32 %v2880_v40, %v1338_v31 }
 0x6c7   :  { %v3405_v32 = vpop.f32.mrf.mxu0 }
 0x6c8   :  { %v1361_v62 = vmax.f32 %v1339_v58, 0.0  ;;  %v3749_v32 = vld [vmem:[#allocation8 + $0x2c8] sm:$0xff]   ;;  %v3752_v58 = vld [vmem:[#allocation8 + $0x330] sm:$0xff]  }
 0x6c9   :  { %v1341_v33 = vpop.f32.mrf.mxu0 }
 0x6ca   :  { %v1342_v55 = vadd.f32 %v2880_v40, %v1341_v33  ;;  %v3750_v33 = vld [vmem:[#allocation8 + $0x2c0] sm:$0xff]  }
 0x6cb   :  { %v3406_v35 = vpop.f32.mrf.mxu0 }
 0x6cc   :  { %v1362_v60 = vmax.f32 %v1342_v55, 0.0  ;;  %v2899_v35 = vld [vmem:[%s4281_s7 + $0xa] ss:$0 sm:$0xff] }
 0x6cd   :  { %v1346_v34 = vpop.f32.mrf.mxu0 }
 0x6ce   :  { %v1347_v51 = vadd.f32 %v2880_v40, %v1346_v34  ;;  %v1368_v63 = vpack.c.bf16 %v1362_v60, %v1361_v62  ;;  %v3754_v60 = vld [vmem:[#allocation8 + $0x320] sm:$0xff]   ;;  %v3756_v62 = vld [vmem:[#allocation8 + $0x310] sm:$0xff]  }
 0x6cf   :  { %v3409_v36 = vpop.f32.mrf.mxu0 }
 0x6d0   :  { %v1363_v59 = vmax.f32 %v1347_v51, 0.0 }
 0x6d1   :  { %v1349_v37 = vpop.f32.mrf.mxu0 }
 0x6d2   :  { %v1350_v48 = vadd.f32 %v2880_v40, %v1349_v37 }
 0x6d3   :  { %v3410_v38 = vpop.f32.mrf.mxu0 }
 0x6d4   :  { %v1364_v56 = vmax.f32 %v1350_v48, 0.0 }
 0x6d5   :  { %v1354_v39 = vpop.f32.mrf.mxu0 }
 0x6d6   :  { %v1355_v44 = vadd.f32 %v2880_v40, %v1354_v39  ;;  %v1369_v61 = vpack.c.bf16 %v1364_v56, %v1363_v59  ;;  %v1748_v56 = vld [vmem:[#allocation7] sm:$0x1]  ;;  %v3753_v59 = vld [vmem:[#allocation8 + $0x328] sm:$0xff]  }
 0x6d7   :  { %v3413_v41 = vpop.f32.mrf.mxu0 }
 0x6d8   :  { %v1365_v52 = vmax.f32 %v1355_v44, 0.0  ;;  %v2908_v44 = vld [vmem:[%s4281_s7 + $0xb] ss:$0 sm:$0xff] }
 0x6d9   :  { %v1357_v46 = vpop.f32.mrf.mxu0 }
 0x6da   :  { %v1358_v49 = vadd.f32 %v2880_v40, %v1357_v46 }
 0x6db   :  { %v3414_v50 = vpop.f32.mrf.mxu0 }
 0x6dc   :  { %v1366_v54 = vmax.f32 %v1358_v49, 0.0 }
 0x6de   :  { %v1370_v57 = vpack.c.bf16 %v1366_v54, %v1365_v52 }
 0x6e0   :  { %3416 = vmatpush3.bf16.msra.mxu1 %v1370_v57  ;;  %v3751_v57 = vld [vmem:[#allocation8 + $0x338] sm:$0xff]  }
 0x6e1   :  { %3417 = vmatprep.subr.bf16.mxu1 %v3941_v21 }
 0x6e4   :  { %3418 = vmatpush3.bf16.msra.mxu1 %v1369_v61  ;;  %v3755_v61 = vld [vmem:[#allocation8 + $0x318] sm:$0xff]  }
 0x6e5   :  { %3419 = vmatprep.subr.bf16.mxu1 %v3941_v21 }
 0x6e8   :  { %3420 = vmatpush3.bf16.msra.mxu1 %v1368_v63  ;;  %v3757_v63 = vld [vmem:[#allocation8 + $0x308] sm:$0xff]  }
 0x6e9   :  { %3445 = vmatprep.subr.bf16.mxu1 %v3941_v21 }
 0x6eb   :  { %3422 = vmatmul.mubr.msk.bf16.vlgmr.msra.gmra.mxu1 %vm1371_vm2, %v1367_v0  ;;  %v3758_v0 = vld [vmem:[#allocation8 + $0x300] sm:$0xff]  }
 0x6ec   :  { %3461 = vmatprep.mubr.msk.bf16.mxu1 %vm3942_vm0, %v3941_v21  ;;  %3446 = vmatpush3.bf16.msra.mxu1 %v3735_v3 }
 0x6ed   :  { %3447 = vmatprep.subr.bf16.mxu1 %v3941_v21 }
 0x6f0   :  { %3448 = vmatpush3.bf16.msra.mxu1 %v3736_v4 }
 0x6f1   :  { %3449 = vmatprep.subr.bf16.mxu1 %v3941_v21 }
 0x6f4   :  { %3450 = vmatpush3.bf16.msra.mxu1 %v3737_v5 }
 0x6f5   :  { %3451 = vmatprep.subr.bf16.mxu1 %v3941_v21 }
 0x6f8   :  { %3452 = vmatpush3.bf16.msra.mxu1 %v3738_v6 }
 0x6f9   :  { %3453 = vmatprep.subr.bf16.mxu1 %v3941_v21 }
 0x6fc   :  { %3454 = vmatpush3.bf16.msra.mxu1 %v3739_v7 }
 0x6fd   :  { %3455 = vmatprep.subr.bf16.mxu1 %v3941_v21 }
 0x700   :  { %3456 = vmatpush3.bf16.msra.mxu1 %v3740_v8  ;;  %v3759_v8 = vld [vmem:[%s4279_s5] sm:$0xff]  }
 0x701   :  { %3457 = vmatprep.subr.bf16.mxu1 %v3941_v21 }
 0x704   :  { %3458 = vmatpush3.bf16.msra.mxu1 %v3741_v9  ;;  %v2918_v9 = vld [vmem:[%s4281_s7 + $0xc] ss:$0 sm:$0xff] }
 0x705   :  { %3459 = vmatprep.subr.bf16.mxu1 %v3941_v21 }
 0x708   :  { %3460 = vmatpush3.bf16.msra.mxu1 %v3742_v17 }
 0x709   :  { %3485 = vmatprep.subr.bf16.mxu1 %v3941_v21 }
 0x7ab   :  { %v1409_v10 = vpop.f32.mrf.mxu1 }
 0x7ac   :  { %v1415_v11 = vmul.f32 0.125, %v1409_v10 }
 0x7ad   :  { %v3423_v12 = vpop.f32.mrf.mxu1 }
 0x7ae   :  { %v1416_v13 = vpack.c.bf16 %v1415_v11, %v1415_v11 }
 0x7af   :  { %v1412_v14 = vpop.f32.mrf.mxu1 }
 0x7b0   :  { %3442 = vmatmul.mubr.bf16.vlgmr.msra.gmra.mxu0 %v1416_v13 }
 0x7b1   :  { %v3424_v15 = vpop.f32.mrf.mxu1  ;;  %3481 = vmatprep.mubr.msk.bf16.mxu0 %vm3942_vm0, %v3941_v21  ;;  %3466 = vmatpush3.bf16.msra.mxu0 %v3743_v18  ;;  %v3761_v18 = vld [vmem:[#allocation8 + $0x378] sm:$0xff]  }
 0x7b2   :  { %3467 = vmatprep.subr.bf16.mxu0 %v3941_v21 }
 0x7b5   :  { %3468 = vmatpush3.bf16.msra.mxu0 %v3744_v22  ;;  %v436_v22 = vadd.f32 %v4029_v16, %v4060_v42  ;;  %v3763_v42 = vld [vmem:[#allocation8 + $0x368] sm:$0xff]  }
 0x7b6   :  { %3469 = vmatprep.subr.bf16.mxu0 %v3941_v21 }
 0x7b9   :  { %3470 = vmatpush3.bf16.msra.mxu0 %v3745_v23  ;;  %v439_v23 = vadd.f32 %v4029_v16, %v4081_v1  ;;  %v3764_v16 = vld [vmem:[#allocation8 + $0x360] sm:$0xff]   ;;  %v3765_v1 = vld [vmem:[#allocation8 + $0x358] sm:$0xff]  }
 0x7ba   :  { %3471 = vmatprep.subr.bf16.mxu0 %v3941_v21 }
 0x7bd   :  { %3472 = vmatpush3.bf16.msra.mxu0 %v3746_v25 }
 0x7be   :  { %3473 = vmatprep.subr.bf16.mxu0 %v3941_v21 }
 0x7c1   :  { %3474 = vmatpush3.bf16.msra.mxu0 %v3747_v26 }
 0x7c2   :  { %3475 = vmatprep.subr.bf16.mxu0 %v3941_v21 }
 0x7c5   :  { %3476 = vmatpush3.bf16.msra.mxu0 %v3748_v27  ;;  %v3762_v27 = vld [vmem:[#allocation8 + $0x370] sm:$0xff]  }
 0x7c6   :  { %3477 = vmatprep.subr.bf16.mxu0 %v3941_v21 }
 0x7c9   :  { %3478 = vmatpush3.bf16.msra.mxu0 %v3749_v32  ;;  %v3772_v32 = vld [vmem:[#allocation8 + $0x3a0] sm:$0xff]  }
 0x7ca   :  { %3479 = vmatprep.subr.bf16.mxu0 %v3941_v21 }
 0x7cd   :  { %3480 = vmatpush3.bf16.msra.mxu0 %v3750_v33  ;;  %v3773_v33 = vld [vmem:[#allocation8 + $0x398] sm:$0xff]  }
 0x870   :  { %v1520_v20 = vpop.f32.mrf.mxu0 }
 0x871   :  { %v1521_v24 = vadd.f32 %v2890_v19, %v1520_v20  ;;  %v1985_v19 = vpack.c.bf16 %v439_v23, %v436_v22  ;;  %v3766_v20 = vld [vmem:[#allocation8 + $0x350] sm:$0xff]  }
 0x872   :  { %v3443_v28 = vpop.f32.mrf.mxu0 }
 0x873   :  { %v1526_v29 = vpack.c.bf16 %v1521_v24, %v1521_v24  ;;  %v3767_v24 = vld [vmem:[#allocation8 + $0x348] sm:$0xff]   ;;  %v3768_v28 = vld [vmem:[#allocation8 + $0x340] sm:$0xff]  }
 0x874   :  { %v1523_v30 = vpop.f32.mrf.mxu0 }
 0x875   :  { %3462 = vmatmul.mubr.bf16.vlgmr.msra.gmra.mxu1 %v1526_v29  ;;  %v3769_v29 = vld [vmem:[#allocation8 + $0x3b8] sm:$0xff]   ;;  %v3770_v30 = vld [vmem:[#allocation8 + $0x3b0] sm:$0xff]  }
 0x876   :  { %v3444_v31 = vpop.f32.mrf.mxu0  ;;  %3487 = vmatprep.mubr.msk.bf16.mxu1 %vm3942_vm0, %v3941_v21 }
 0x877   :  { %v3771_v31 = vld [vmem:[#allocation8 + $0x3a8] sm:$0xff]  }
 0x935   :  { %v1630_v34 = vpop.f32.mrf.mxu1 }
 0x936   :  { %v1631_v36 = vadd.f32 %v2899_v35, %v1630_v34  ;;  %v3774_v35 = vld [vmem:[#allocation8 + $0x390] sm:$0xff]  }
 0x937   :  { %v3463_v37 = vpop.f32.mrf.mxu1  ;;  %v3778_v34 = vld [vmem:[#allocation8 + $0x3f0] sm:$0xff]  }
 0x938   :  { %v1636_v38 = vmax.f32 %v1631_v36, 0.0  ;;  %v3779_v36 = vld [vmem:[#allocation8 + $0x3e8] sm:$0xff]   ;;  %v3780_v37 = vld [vmem:[#allocation8 + $0x3e0] sm:$0xff]  }
 0x939   :  { %v1633_v39 = vpop.f32.mrf.mxu1 }
 0x93a   :  { %v1637_v40 = vpack.c.bf16 %v1636_v38, %v1636_v38  ;;  %v3781_v38 = vld [vmem:[#allocation8 + $0x3d8] sm:$0xff]  }
 0x93b   :  { %v3464_v41 = vpop.f32.mrf.mxu1 }
 0x93c   :  { %3482 = vmatmul.mubr.bf16.vlgmr.msra.gmra.mxu0 %v1637_v40 }
 0x93d   :  { %3513 = vmatprep.mubr.msk.bf16.mxu0 %vm1925_vm5, %v3759_v8  ;;  %v3786_v8 = vld [vmem:[#allocation8 + $0x430] sm:$0xff]  }
 0x9fc   :  { %v1741_v46 = vpop.f32.mrf.mxu0 }
 0x9fd   :  { %v1742_v48 = vadd.f32 %v2908_v44, %v1741_v46 }
 0x9fe   :  { %v3483_v49 = vpop.f32.mrf.mxu0 }
 0x9ff   :  { %v1747_v50 = vmax.f32 %v1742_v48, 0.0  ;;  %v2931_v48 = vld [vmem:[%s4281_s7 + $0xd] ss:$0 sm:$0xff] }
 0xa00   :  { %v1744_v51 = vpop.f32.mrf.mxu0 }
 0xa01   :  { %v1749_v52 = vpack.c.bf16 %v1747_v50, %v1747_v50 }
 0xa02   :  { %v3484_v54 = vpop.f32.mrf.mxu0 }
 0xa03   :  { %v1756_v55 = vsel %vm1754_vm3, %v1749_v52, 0 }
 0xa04   :  { %3486 = vmatpush3.bf16.msra.mxu1 %v1756_v55 }
 0xa05   :  { %3491 = vmatprep.subr.bf16.mxu1 %v3941_v21 }
 0xa07   :  { %3488 = vmatmul.mubr.msk.bf16.vlgmr.msra.gmra.mxu1 %vm1750_vm4, %v1748_v56 }
 0xa08   :  { %3492 = vmatpush3.bf16.msra.mxu1 %v3751_v57  ;;  %3507 = vmatprep.mubr.msk.bf16.mxu1 %vm3942_vm0, %v3941_v21 }
 0xa09   :  { %3493 = vmatprep.subr.bf16.mxu1 %v3941_v21 }
 0xa0c   :  { %3494 = vmatpush3.bf16.msra.mxu1 %v3752_v58 }
 0xa0d   :  { %3495 = vmatprep.subr.bf16.mxu1 %v3941_v21 }
 0xa10   :  { %3496 = vmatpush3.bf16.msra.mxu1 %v3753_v59 }
 0xa11   :  { %3497 = vmatprep.subr.bf16.mxu1 %v3941_v21 }
 0xa14   :  { %3498 = vmatpush3.bf16.msra.mxu1 %v3754_v60 }
 0xa15   :  { %3499 = vmatprep.subr.bf16.mxu1 %v3941_v21 }
 0xa18   :  { %3500 = vmatpush3.bf16.msra.mxu1 %v3755_v61 }
 0xa19   :  { %3501 = vmatprep.subr.bf16.mxu1 %v3941_v21 }
 0xa1c   :  { %3502 = vmatpush3.bf16.msra.mxu1 %v3756_v62 }
 0xa1d   :  { %3503 = vmatprep.subr.bf16.mxu1 %v3941_v21 }
 0xa20   :  { %3504 = vmatpush3.bf16.msra.mxu1 %v3757_v63 }
 0xa21   :  { %3505 = vmatprep.subr.bf16.mxu1 %v3941_v21  ;;  %v2853_v21 = vld [vmem:[%s4281_s7 + $0x5] ss:$0 sm:$0xff] }
 0xa22   :  { %v951_v11 = vadd.f32 %v2853_v21, %v4156_v53  ;;  %v3760_v53 = vld [vmem:[%s4279_s5 + $0x8] sm:$0xff]   ;;  %v3787_v21 = vld [vmem:[#allocation8 + $0x428] sm:$0xff]  }
 0xa24   :  { %3506 = vmatpush3.bf16.msra.mxu1 %v3758_v0 }
 0xa25   :  { %3537 = vmatprep.subr.bf16.mxu1 %v3769_v29 }
 0xac7   :  { %v1792_v2 = vpop.f32.mrf.mxu1 }
 0xac8   :  { %v1798_v3 = vmul.f32 0.33333334, %v1792_v2 }
 0xac9   :  { %v3489_v4 = vpop.f32.mrf.mxu1 }
 0xaca   :  { %v1799_v5 = vpack.c.bf16 %v1798_v3, %v1798_v3  ;;  %v3782_v4 = vld [vmem:[#allocation8 + $0x3d0] sm:$0xff]  }
 0xacb   :  { %v1795_v6 = vpop.f32.mrf.mxu1 }
 0xacc   :  { %3508 = vmatmul.mubr.bf16.vlgmr.msra.gmra.mxu1 %v1799_v5  ;;  %v3783_v5 = vld [vmem:[#allocation8 + $0x3c8] sm:$0xff]   ;;  %v3784_v6 = vld [vmem:[#allocation8 + $0x3c0] sm:$0xff]  }
 0xacd   :  { %v3490_v7 = vpop.f32.mrf.mxu1  ;;  %3538 = vmatpush3.bf16.msra.mxu1 %v3769_v29  ;;  %v3795_v29 = vld [vmem:[#allocation8 + $0x468] sm:$0xff]  }
 0xace   :  { %3539 = vmatprep.subr.bf16.mxu1 %v3770_v30  ;;  %v3785_v7 = vld [vmem:[#allocation8 + $0x438] sm:$0xff]  }
 0xad1   :  { %3540 = vmatpush3.bf16.msra.mxu1 %v3770_v30  ;;  %v3796_v30 = vld [vmem:[#allocation8 + $0x460] sm:$0xff]  }
 0xad2   :  { %3541 = vmatprep.subr.bf16.mxu1 %v3771_v31 }
 0xad5   :  { %3542 = vmatpush3.bf16.msra.mxu1 %v3771_v31  ;;  %v3797_v31 = vld [vmem:[#allocation8 + $0x458] sm:$0xff]  }
 0xad6   :  { %3543 = vmatprep.subr.bf16.mxu1 %v3772_v32 }
 0xad9   :  { %3544 = vmatpush3.bf16.msra.mxu1 %v3772_v32 }
 0xada   :  { %3545 = vmatprep.subr.bf16.mxu1 %v3773_v33 }
 0xadd   :  { %3546 = vmatpush3.bf16.msra.mxu1 %v3773_v33 }
 0xade   :  { %3547 = vmatprep.subr.bf16.mxu1 %v3774_v35 }
 0xae1   :  { %3548 = vmatpush3.bf16.msra.mxu1 %v3774_v35  ;;  %v2949_v35 = vld [vmem:[%s4281_s7 + $0xf] ss:$0 sm:$0xff] }
 0xae2   :  { %3549 = vmatprep.subr.bf16.mxu1 %v3775_v43 }
 0xae5   :  { %3550 = vmatpush3.bf16.msra.mxu1 %v3775_v43 }
 0xae6   :  { %3551 = vmatprep.subr.bf16.mxu1 %v3776_v45 }
 0xae9   :  { %3552 = vmatpush3.bf16.msra.mxu1 %v3776_v45 }
 0xaea   :  { %3577 = vmatprep.subr.bf16.mxu1 %v3785_v7 }
 0xb8c   :  { %v1903_v10 = vpop.f32.mrf.mxu1 }
 0xb8d   :  { %v1904_v12 = vadd.f32 %v2918_v9, %v1903_v10  ;;  %v3788_v9 = vld [vmem:[#allocation8 + $0x420] sm:$0xff]   ;;  %v3789_v10 = vld [vmem:[#allocation8 + $0x418] sm:$0xff]  }
 0xb8e   :  { %v3509_v13 = vpop.f32.mrf.mxu1 }
 0xb8f   :  { %v1909_v14 = vadd.f32 %v1904_v12, %v951_v11  ;;  %v2940_v13 = vld [vmem:[%s4281_s7 + $0xe] ss:$0 sm:$0xff] }
 0xb90   :  { %v1906_v15 = vpop.f32.mrf.mxu1 }
 0xb91   :  { %v1914_v17 = vpack.c.bf16 %v1909_v14, %v1909_v14 }
 0xb92   :  { %v3510_v25 = vpop.f32.mrf.mxu1 }
 0xb93   :  { %3637 = vmatprep.subr.msk.bf16.mxu0 %vm1932_vm6, %v1914_v17  ;;  %v1934_v26 = vsel %vm1932_vm6, %v1914_v17, 0 }
 0xb94   :  { %3512 = vmatpush3.bf16.msra.mxu0 %v1934_v26 }
 0xb95   :  { %3517 = vmatprep.subr.bf16.mxu0 %v3761_v18 }
 0xb97   :  { %3514 = vmatmul.mubr.msk.bf16.vlgmr.msra.gmra.mxu0 %vm1925_vm5, %v3760_v53 }
 0xb98   :  { %3518 = vmatpush3.bf16.msra.mxu0 %v3761_v18  ;;  %3533 = vmatprep.mubr.bf16.mxu0 %v1985_v19 }
 0xb99   :  { %3519 = vmatprep.subr.bf16.mxu0 %v3762_v27 }
 0xb9c   :  { %3520 = vmatpush3.bf16.msra.mxu0 %v3762_v27 }
 0xb9d   :  { %3521 = vmatprep.subr.bf16.mxu0 %v3763_v42 }
 0xba0   :  { %3522 = vmatpush3.bf16.msra.mxu0 %v3763_v42 }
 0xba1   :  { %3523 = vmatprep.subr.bf16.mxu0 %v3764_v16 }
 0xba4   :  { %3524 = vmatpush3.bf16.msra.mxu0 %v3764_v16  ;;  %v3790_v16 = vld [vmem:[#allocation8 + $0x410] sm:$0xff]  }
 0xba5   :  { %3525 = vmatprep.subr.bf16.mxu0 %v3765_v1 }
 0xba8   :  { %3526 = vmatpush3.bf16.msra.mxu0 %v3765_v1  ;;  %v3791_v1 = vld [vmem:[#allocation8 + $0x408] sm:$0xff]  }
 0xba9   :  { %3527 = vmatprep.subr.bf16.mxu0 %v3766_v20 }
 0xbac   :  { %3528 = vmatpush3.bf16.msra.mxu0 %v3766_v20  ;;  %v3792_v20 = vld [vmem:[#allocation8 + $0x400] sm:$0xff]  }
 0xbad   :  { %3529 = vmatprep.subr.bf16.mxu0 %v3767_v24 }
 0xbb0   :  { %3530 = vmatpush3.bf16.msra.mxu0 %v3767_v24  ;;  %v3793_v24 = vld [vmem:[#allocation8 + $0x478] sm:$0xff]  }
 0xbb1   :  { %3531 = vmatprep.subr.bf16.mxu0 %v3768_v28 }
 0xbb4   :  { %3532 = vmatpush3.bf16.msra.mxu0 %v3768_v28  ;;  %v3794_v28 = vld [vmem:[#allocation8 + $0x470] sm:$0xff]  }
 0xbb7   :  { %3534 = vmatmul.mubr.bf16.vlgmr.msra.gmra.mxu0 %v1986_v47  ;;  %v3777_v47 = vld [vmem:[#allocation8 + $0x3f8] sm:$0xff]  }
 0xbb8   :  { %3557 = vmatprep.subr.bf16.mxu0 %v3777_v47 }
 0xbb9   :  { %3558 = vmatpush3.bf16.msra.mxu0 %v3777_v47 }
 0xbba   :  { %3559 = vmatprep.subr.bf16.mxu0 %v3778_v34 }
 0xbbd   :  { %3560 = vmatpush3.bf16.msra.mxu0 %v3778_v34 }
 0xbbe   :  { %3561 = vmatprep.subr.bf16.mxu0 %v3779_v36 }
 0xbc1   :  { %3562 = vmatpush3.bf16.msra.mxu0 %v3779_v36 }
 0xbc2   :  { %3563 = vmatprep.subr.bf16.mxu0 %v3780_v37 }
 0xbc5   :  { %3564 = vmatpush3.bf16.msra.mxu0 %v3780_v37 }
 0xbc6   :  { %3565 = vmatprep.subr.bf16.mxu0 %v3781_v38 }
 0xbc9   :  { %3566 = vmatpush3.bf16.msra.mxu0 %v3781_v38 }
 0xbca   :  { %3567 = vmatprep.subr.bf16.mxu0 %v3782_v4 }
 0xbcd   :  { %3568 = vmatpush3.bf16.msra.mxu0 %v3782_v4 }
 0xbce   :  { %3569 = vmatprep.subr.bf16.mxu0 %v3783_v5 }
 0xbd1   :  { %3570 = vmatpush3.bf16.msra.mxu0 %v3783_v5 }
 0xbd2   :  { %3571 = vmatprep.subr.bf16.mxu0 %v3784_v6 }
 0xbd5   :  { %3572 = vmatpush3.bf16.msra.mxu0 %v3784_v6 }
 0xbd6   :  { %3597 = vmatprep.subr.bf16.mxu0 %v3793_v24 }
 0xc57   :  { %v3515_v39 = vpop.f32.mrf.mxu0 }
 0xc59   :  { %v1970_v40 = vpop.f32.mrf.mxu0 }
 0xc5b   :  { %v3516_v41 = vpop.f32.mrf.mxu0 }
 0xc5d   :  { %v1973_v44 = vpop.f32.mrf.mxu0 }
 0xc77   :  { %v3535_v46 = vpop.f32.mrf.mxu0 }
 0xc78   :  { %v2099_v51 = vadd.f32 %v3535_v46, %v2931_v48 }
 0xc79   :  { %v2090_v49 = vpop.f32.mrf.mxu0 }
 0xc7a   :  { %v2091_v50 = vadd.f32 %v2931_v48, %v2090_v49  ;;  %v2107_v59 = vadd.f32 %v3515_v39, %v2099_v51  ;;  %v3799_v49 = vld [vmem:[#allocation8 + $0x448] sm:$0xff]   ;;  %v3801_v51 = vld [vmem:[#allocation8 + $0x4b8] sm:$0xff]  }
 0xc7b   :  { %v3536_v52 = vpop.f32.mrf.mxu0 }
 0xc7c   :  { %v2102_v54 = vadd.f32 %v3536_v52, %v2931_v48  ;;  %v2105_v56 = vadd.f32 %v2091_v50, %v1970_v40  ;;  %v2111_v0 = vmax.f32 %v2107_v59, 0.0  ;;  %v3800_v50 = vld [vmem:[#allocation8 + $0x440] sm:$0xff]   ;;  %v3802_v52 = vld [vmem:[#allocation8 + $0x4b0] sm:$0xff]   ;;  %v2958_v59 = vld [vmem:[%s4281_s7 + $0x10] ss:$0 sm:$0xff] }
 0xc7d   :  { %v2093_v55 = vpop.f32.mrf.mxu0 }
 0xc7e   :  { %v2108_v57 = vadd.f32 %v3516_v41, %v2102_v54  ;;  %v2094_v58 = vadd.f32 %v2931_v48, %v2093_v55  ;;  %v2109_v62 = vmax.f32 %v2105_v56, 0.0  ;;  %v3798_v48 = vld [vmem:[#allocation8 + $0x450] sm:$0xff]   ;;  %v3803_v54 = vld [vmem:[#allocation8 + $0x4a8] sm:$0xff]   ;;  %v3804_v55 = vld [vmem:[#allocation8 + $0x4a0] sm:$0xff]  }
 0xc7f   :  { %v3805_v56 = vld [vmem:[#allocation8 + $0x498] sm:$0xff]  }
 0xc80   :  { %v2106_v60 = vadd.f32 %v2094_v58, %v1973_v44  ;;  %v2112_v61 = vmax.f32 %v2108_v57, 0.0 }
 0xc82   :  { %v2110_v63 = vmax.f32 %v2106_v60, 0.0  ;;  %v2114_v3 = vpack.c.bf16 %v2112_v61, %v2111_v0 }
 0xc84   :  { %v2113_v2 = vpack.c.bf16 %v2110_v63, %v2109_v62 }
 0xc86   :  { %3553 = vmatprep.mubr.bf16.mxu1 %v2113_v2 }
 0xc87   :  { %3554 = vmatmul.mubr.bf16.vlgmr.msra.gmra.mxu1 %v2114_v3 }
 0xc88   :  { %3578 = vmatpush3.bf16.msra.mxu1 %v3785_v7 }
 0xc89   :  { %3579 = vmatprep.subr.bf16.mxu1 %v3786_v8 }
 0xc8c   :  { %3580 = vmatpush3.bf16.msra.mxu1 %v3786_v8 }
 0xc8d   :  { %3581 = vmatprep.subr.bf16.mxu1 %v3787_v21 }
 0xc90   :  { %3582 = vmatpush3.bf16.msra.mxu1 %v3787_v21  ;;  %v3806_v21 = vld [vmem:[#allocation8 + $0x490] sm:$0xff]  }
 0xc91   :  { %3583 = vmatprep.subr.bf16.mxu1 %v3788_v9 }
 0xc94   :  { %3584 = vmatpush3.bf16.msra.mxu1 %v3788_v9  ;;  %v3807_v9 = vld [vmem:[#allocation8 + $0x488] sm:$0xff]  }
 0xc95   :  { %3585 = vmatprep.subr.bf16.mxu1 %v3789_v10 }
 0xc98   :  { %3586 = vmatpush3.bf16.msra.mxu1 %v3789_v10  ;;  %v3808_v10 = vld [vmem:[#allocation8 + $0x480] sm:$0xff]  }
 0xc99   :  { %3587 = vmatprep.subr.bf16.mxu1 %v3790_v16 }
 0xc9c   :  { %3588 = vmatpush3.bf16.msra.mxu1 %v3790_v16  ;;  %v2976_v16 = vld [vmem:[%s4281_s7 + $0x12] ss:$0 sm:$0xff] }
 0xc9d   :  { %3589 = vmatprep.subr.bf16.mxu1 %v3791_v1 }
 0xca0   :  { %3590 = vmatpush3.bf16.msra.mxu1 %v3791_v1 }
 0xca1   :  { %3591 = vmatprep.subr.bf16.mxu1 %v3792_v20 }
 0xca4   :  { %3592 = vmatpush3.bf16.msra.mxu1 %v3792_v20 }
 0xca5   :  { %3617 = vmatprep.subr.bf16.mxu1 %v3801_v51 }
 0xd47   :  { %v3555_v11 = vpop.f32.mrf.mxu1 }
 0xd48   :  { %v2227_v18 = vadd.f32 %v3555_v11, %v2940_v13 }
 0xd49   :  { %v2218_v12 = vpop.f32.mrf.mxu1 }
 0xd4a   :  { %v2219_v15 = vadd.f32 %v2940_v13, %v2218_v12  ;;  %v2235_v27 = vmax.f32 %v2227_v18, 0.0 }
 0xd4b   :  { %v3556_v14 = vpop.f32.mrf.mxu1 }
 0xd4c   :  { %v2230_v17 = vadd.f32 %v3556_v14, %v2940_v13  ;;  %v2233_v26 = vmax.f32 %v2219_v15, 0.0 }
 0xd4d   :  { %v2221_v22 = vpop.f32.mrf.mxu1 }
 0xd4e   :  { %v2222_v23 = vadd.f32 %v2940_v13, %v2221_v22  ;;  %v2236_v25 = vmax.f32 %v2230_v17, 0.0  ;;  %v2967_v13 = vld [vmem:[%s4281_s7 + $0x11] ss:$0 sm:$0xff]  ;;  %s3943_s7 = smov [#allocation10]  }
 0xd4f   :  { %s2787_s23 = sshll.u32 %s3943_s7, 4  ;;  %s2788_s23 = int_to_ptr.vmem [resolvable:$true] %s2787_s23 }
 0xd50   :  { %v2234_v53 = vmax.f32 %v2222_v23, 0.0  ;;  %v2238_v42 = vpack.c.bf16 %v2236_v25, %v2235_v27  ;;  %s3905_s3 = scalar_lea.vmem %s2788_s23, 512  ;;  %p3910_p7 = scmp.lt.s32.totalorder %s2788_s23, %s2788_s23 }
 0xd51   :  { %p3906_p6 = scmp.ne.s32.totalorder %s2788_s23, %s3905_s3  ;;  %p3911_p8 = scmp.lt.s32.totalorder %s3905_s3, %s3905_s3 }
 0xd52   :  { %v2237_v19 = vpack.c.bf16 %v2234_v53, %v2233_v26 }
 0xd53   :  { %p3912_p9 = por %p3911_p8, %p3910_p7 }
 0xd54   :  { %3573 = vmatprep.mubr.bf16.mxu0 %v2237_v19 }
 0xd55   :  { %3574 = vmatmul.mubr.bf16.vlgmr.msra.gmra.mxu0 %v2238_v42  ;;  %p3913_p10 = pnand %p3912_p9, %p3906_p6 }
 0xd56   :  { %3598 = vmatpush3.bf16.msra.mxu0 %v3793_v24 }
 0xd57   :  { %3599 = vmatprep.subr.bf16.mxu0 %v3794_v28 }
 0xd5a   :  { %3600 = vmatpush3.bf16.msra.mxu0 %v3794_v28 }
 0xd5b   :  { %3601 = vmatprep.subr.bf16.mxu0 %v3795_v29 }
 0xd5e   :  { %3602 = vmatpush3.bf16.msra.mxu0 %v3795_v29 }
 0xd5f   :  { %3603 = vmatprep.subr.bf16.mxu0 %v3796_v30 }
 0xd62   :  { %3604 = vmatpush3.bf16.msra.mxu0 %v3796_v30 }
 0xd63   :  { %3605 = vmatprep.subr.bf16.mxu0 %v3797_v31 }
 0xd66   :  { %3606 = vmatpush3.bf16.msra.mxu0 %v3797_v31 }
 0xd67   :  { %3607 = vmatprep.subr.bf16.mxu0 %v3798_v48 }
 0xd6a   :  { %3608 = vmatpush3.bf16.msra.mxu0 %v3798_v48 }
 0xd6b   :  { %3609 = vmatprep.subr.bf16.mxu0 %v3799_v49 }
 0xd6e   :  { %3610 = vmatpush3.bf16.msra.mxu0 %v3799_v49 }
 0xd6f   :  { %3611 = vmatprep.subr.bf16.mxu0 %v3800_v50 }
 0xd72   :  { %3612 = vmatpush3.bf16.msra.mxu0 %v3800_v50 }
 0xe15   :  { %v3575_v32 = vpop.f32.mrf.mxu0 }
 0xe16   :  { %v2351_v34 = vadd.f32 %v3575_v32, %v2949_v35 }
 0xe17   :  { %v2342_v33 = vpop.f32.mrf.mxu0 }
 0xe18   :  { %v2343_v45 = vadd.f32 %v2949_v35, %v2342_v33  ;;  %v2359_v41 = vmax.f32 %v2351_v34, 0.0 }
 0xe19   :  { %v3576_v43 = vpop.f32.mrf.mxu0 }
 0xe1a   :  { %v2354_v47 = vadd.f32 %v3576_v43, %v2949_v35  ;;  %v2357_v39 = vmax.f32 %v2343_v45, 0.0 }
 0xe1b   :  { %v2345_v36 = vpop.f32.mrf.mxu0 }
 0xe1c   :  { %v2346_v37 = vadd.f32 %v2949_v35, %v2345_v36  ;;  %v2360_v38 = vmax.f32 %v2354_v47, 0.0 }
 0xe1e   :  { %v2358_v40 = vmax.f32 %v2346_v37, 0.0  ;;  %v2362_v46 = vpack.c.bf16 %v2360_v38, %v2359_v41 }
 0xe20   :  { %v2361_v44 = vpack.c.bf16 %v2358_v40, %v2357_v39 }
 0xe22   :  { %3593 = vmatprep.mubr.bf16.mxu1 %v2361_v44 }
 0xe23   :  { %3594 = vmatmul.mubr.bf16.vlgmr.msra.gmra.mxu1 %v2362_v46 }
 0xe24   :  { %3618 = vmatpush3.bf16.msra.mxu1 %v3801_v51 }
 0xe25   :  { %3619 = vmatprep.subr.bf16.mxu1 %v3802_v52 }
 0xe28   :  { %3620 = vmatpush3.bf16.msra.mxu1 %v3802_v52 }
 0xe29   :  { %3621 = vmatprep.subr.bf16.mxu1 %v3803_v54 }
 0xe2c   :  { %3622 = vmatpush3.bf16.msra.mxu1 %v3803_v54 }
 0xe2d   :  { %3623 = vmatprep.subr.bf16.mxu1 %v3804_v55 }
 0xe30   :  { %3624 = vmatpush3.bf16.msra.mxu1 %v3804_v55 }
 0xe31   :  { %3625 = vmatprep.subr.bf16.mxu1 %v3805_v56 }
 0xe34   :  { %3626 = vmatpush3.bf16.msra.mxu1 %v3805_v56 }
 0xe35   :  { %3627 = vmatprep.subr.bf16.mxu1 %v3806_v21 }
 0xe38   :  { %3628 = vmatpush3.bf16.msra.mxu1 %v3806_v21 }
 0xe39   :  { %3629 = vmatprep.subr.bf16.mxu1 %v3807_v9 }
 0xe3c   :  { %3630 = vmatpush3.bf16.msra.mxu1 %v3807_v9 }
 0xe3d   :  { %3631 = vmatprep.subr.bf16.mxu1 %v3808_v10 }
 0xe40   :  { %3632 = vmatpush3.bf16.msra.mxu1 %v3808_v10 }
 0xee3   :  { %v3595_v57 = vpop.f32.mrf.mxu1 }
 0xee4   :  { %v2475_v63 = vadd.f32 %v3595_v57, %v2958_v59 }
 0xee5   :  { %v2466_v58 = vpop.f32.mrf.mxu1 }
 0xee6   :  { %v2467_v61 = vadd.f32 %v2958_v59, %v2466_v58  ;;  %v2483_v6 = vmax.f32 %v2475_v63, 0.0 }
 0xee7   :  { %v3596_v60 = vpop.f32.mrf.mxu1 }
 0xee8   :  { %v2478_v62 = vadd.f32 %v3596_v60, %v2958_v59  ;;  %v2481_v4 = vmax.f32 %v2467_v61, 0.0 }
 0xee9   :  { %v2469_v0 = vpop.f32.mrf.mxu1 }
 0xeea   :  { %v2470_v2 = vadd.f32 %v2958_v59, %v2469_v0  ;;  %v2484_v3 = vmax.f32 %v2478_v62, 0.0 }
 0xeec   :  { %v2482_v5 = vmax.f32 %v2470_v2, 0.0  ;;  %v2486_v8 = vpack.c.bf16 %v2484_v3, %v2483_v6 }
 0xeee   :  { %v2485_v7 = vpack.c.bf16 %v2482_v5, %v2481_v4 }
 0xef0   :  { %3613 = vmatprep.mubr.bf16.mxu0 %v2485_v7 }
 0xef1   :  { %3614 = vmatmul.mubr.bf16.vlgmr.msra.gmra.mxu0 %v2486_v8 }
 0xfb1   :  { %v3615_v11 = vpop.f32.mrf.mxu0 }
 0xfb2   :  { %v2599_v18 = vadd.f32 %v3615_v11, %v2967_v13 }
 0xfb3   :  { %v2590_v12 = vpop.f32.mrf.mxu0 }
 0xfb4   :  { %v2591_v15 = vadd.f32 %v2967_v13, %v2590_v12  ;;  %v2607_v27 = vmax.f32 %v2599_v18, 0.0 }
 0xfb5   :  { %v3616_v14 = vpop.f32.mrf.mxu0 }
 0xfb6   :  { %v2602_v17 = vadd.f32 %v3616_v14, %v2967_v13  ;;  %v2605_v26 = vmax.f32 %v2591_v15, 0.0 }
 0xfb7   :  { %v2593_v22 = vpop.f32.mrf.mxu0 }
 0xfb8   :  { %v2594_v23 = vadd.f32 %v2967_v13, %v2593_v22  ;;  %v2608_v25 = vmax.f32 %v2602_v17, 0.0 }
 0xfba   :  { %v2606_v53 = vmax.f32 %v2594_v23, 0.0  ;;  %v2610_v42 = vpack.c.bf16 %v2608_v25, %v2607_v27 }
 0xfbc   :  { %v2609_v19 = vpack.c.bf16 %v2606_v53, %v2605_v26 }
 0xfbe   :  { %3633 = vmatprep.mubr.bf16.mxu1 %v2609_v19 }
 0xfbf   :  { %3634 = vmatmul.mubr.bf16.vlgmr.msra.gmra.mxu1 %v2610_v42 }
0x107f   :  { %v3635_v1 = vpop.f32.mrf.mxu1 }
0x1080   :  { %v2723_v20 = vadd.f32 %v3635_v1, %v2976_v16 }
0x1081   :  { %v2714_v24 = vpop.f32.mrf.mxu1 }
0x1082   :  { %2731 = vst [vmem:[#allocation10 + $0x10] sm:$0xff] %v2723_v20  ;;  %v2739_v28 = vand.u32 2147483647, %v2723_v20  ;;  %v2715_v29 = vadd.f32 %v2976_v16, %v2714_v24  ;;  %v2735_v56 = vmax.f32 %v2723_v20, 0.0 }
0x1083   :  { %v3636_v30 = vpop.f32.mrf.mxu1 }
0x1084   :  { %v2743_v31 = vsub.f32 0.0, %v2739_v28  ;;  %2729 = vst [vmem:[#allocation10] sm:$0xff] %v2715_v29  ;;  %v2737_v32 = vand.u32 2147483647, %v2715_v29  ;;  %v2726_v33 = vadd.f32 %v3636_v30, %v2976_v16  ;;  %v2733_v60 = vmax.f32 %v2715_v29, 0.0 }
0x1085   :  { %v2717_v35 = vpop.f32.mrf.mxu1 }
0x1086   :  { %v2749_v43 = vmul.f32 1.442695, %v2743_v31  ;;  %v2741_v45 = vsub.f32 0.0, %v2737_v32  ;;  %2732 = vst [vmem:[#allocation10 + $0x18] sm:$0xff] %v2726_v33  ;;  %v2740_v47 = vand.u32 2147483647, %v2726_v33  ;;  %v2718_v34 = vadd.f32 %v2976_v16, %v2717_v35 }
0x1087   :  { %v2736_v2 = vmax.f32 %v2726_v33, 0.0 }
0x1088   :  { %3809 = vpow2.f32 %v2749_v43  ;;  %v2745_v36 = vmul.f32 1.442695, %v2741_v45  ;;  %v2744_v37 = vsub.f32 0.0, %v2740_v47  ;;  %2730 = vst [vmem:[#allocation10 + $0x8] sm:$0xff] %v2718_v34  ;;  %v2738_v38 = vand.u32 2147483647, %v2718_v34 }
0x1089   :  { %v2734_v8 = vmax.f32 %v2718_v34, 0.0 }
0x108a   :  { %3811 = vpow2.f32 %v2745_v36  ;;  %v2751_v39 = vmul.f32 1.442695, %v2744_v37  ;;  %v2742_v40 = vsub.f32 0.0, %v2738_v38 }
0x108c   :  { %3813 = vpow2.f32 %v2751_v39  ;;  %v2747_v41 = vmul.f32 1.442695, %v2742_v40 }
0x108e   :  { %3815 = vpow2.f32 %v2747_v41 }
0x1095   :  { %v3810_v44 = vpop.eup %3809 }
0x1096   :  { %v2755_v46 = vadd.f32 1.0, %v3810_v44 }
0x1097   :  { %v3812_v48 = vpop.eup %3811 }
0x1098   :  { %3817 = vlog2.f32 %v2755_v46  ;;  %v2753_v49 = vadd.f32 1.0, %v3812_v48 }
0x1099   :  { %v3814_v50 = vpop.eup %3813 }
0x109a   :  { %3819 = vlog2.f32 %v2753_v49  ;;  %v2756_v51 = vadd.f32 1.0, %v3814_v50 }
0x109b   :  { %v3816_v52 = vpop.eup %3815 }
0x109c   :  { %3821 = vlog2.f32 %v2756_v51  ;;  %v2754_v54 = vadd.f32 1.0, %v3816_v52 }
0x109e   :  { %3823 = vlog2.f32 %v2754_v54 }
0x10a5   :  { %v3818_v55 = vpop.eup %3817 }
0x10a6   :  { %v2762_v57 = vmul.f32 0.6931472, %v3818_v55 }
0x10a7   :  { %v3820_v58 = vpop.eup %3819 }
0x10a8   :  { %v2767_v59 = vadd.f32 %v2762_v57, %v2735_v56  ;;  %v2758_v61 = vmul.f32 0.6931472, %v3820_v58 }
0x10a9   :  { %v3822_v62 = vpop.eup %3821 }
0x10aa   :  { %v2771_v63 = vmul.f32 0.99, %v2767_v59  ;;  %v2765_v0 = vadd.f32 %v2758_v61, %v2733_v60  ;;  %v2764_v3 = vmul.f32 0.6931472, %v3822_v62 }
0x10ab   :  { %v3824_v4 = vpop.eup %3823 }
0x10ac   :  { %v2775_v5 = vadd.f32 0.01, %v2771_v63  ;;  %v2769_v6 = vmul.f32 0.99, %v2765_v0  ;;  %v2768_v7 = vadd.f32 %v2764_v3, %v2736_v2  ;;  %v2760_v21 = vmul.f32 0.6931472, %v3824_v4 }
0x10ae   :  { %v2773_v9 = vadd.f32 0.01, %v2769_v6  ;;  %v2772_v10 = vmul.f32 0.99, %v2768_v7  ;;  %2780 = vst.msk [vmem:[#allocation10 + $0x10] sm:$0xff] %vm2777_vm7, %v2775_v5  ;;  %v2766_v11 = vadd.f32 %v2760_v21, %v2734_v8 }
0x10b0   :  { %v2776_v12 = vadd.f32 0.01, %v2772_v10  ;;  %2778 = vst.msk [vmem:[#allocation10] sm:$0xff] %vm2777_vm7, %v2773_v9  ;;  %v2770_v13 = vmul.f32 0.99, %v2766_v11 }
0x10b2   :  { %2781 = vst.msk [vmem:[#allocation10 + $0x18] sm:$0xff] %vm2777_vm7, %v2776_v12  ;;  %v2774_v14 = vadd.f32 0.01, %v2770_v13 }
0x10b4   :  { %2779 = vst.msk [vmem:[#allocation10 + $0x8] sm:$0xff] %vm2777_vm7, %v2774_v14 }
0x10b5   :  { %3916 = shalt.err (!%p3913_p10)
}
0x10b6   :  { %2793 = dma.vmem_to_hbm [thread:$0]  %s2788_s23, 512, %s4282_s8, [#allocation4], %s3934_s30, %s3934_s30, %s3935_s9  }
0x10b7   :  { %3931 = dma.done.wait [#allocation4], 512  }
0x10b8   :  { %3932 = vsyncadd [#allocation4], 4294966784 }
0x10b9   :  { %2797 = vsyncpa [#allocation3], 1 }
0x10ba   :  { %2798 = vsyncpa [#allocation6], 1 }
0x10bb   :  { %2799 = vsyncpa [#allocation9], 1 }
0x10bc   :  { %2800 = vsyncpa [#allocation4], 1 }

</bundles_post_ra>
